<compile_context>
chip_gen: v7x
topology: tpu7x:2x2x1
jax: 0.10.0
libtpu: 0.0.40
codegen_flags: <defaults>
</compile_context>

<pallas_src>
import functools

import jax
import jax.numpy as jnp
from jax.experimental import pallas as pl
from jax.experimental.pallas import tpu as pltpu


def _qrnn_layer_kernel(x_ref, w_ref, b_ref, h_ref, c_last_ref,
                       fz_scr, omf_scr, o_scr, cseq_scr, c_state):
    """One (batch-tile, time-tile) block of a QRNN layer.

    x_ref      : (TS, TB, Din) bf16   input tile
    w_ref      : (Din, 3H)     bf16   layer weight (resident across grid)
    b_ref      : (1, 3H)       f32    layer bias   (resident across grid)
    h_ref      : (TS, TB, H)          output hidden tile  H_t = sigmoid(O)*C_t
    c_last_ref : (1, TB, H)           final cell state for this batch tile
    fz_scr     : (TS, TB, H)   f32    F*Z         (precomputed, parallel phase)
    omf_scr    : (TS, TB, H)   f32    1-F         (precomputed, parallel phase)
    o_scr      : (TS, TB, H)   f32    sigmoid(O)  (precomputed, parallel phase)
    cseq_scr   : (TS, TB, H)   f32    C_t sequence written by the serial scan
    c_state    : (TB, H)       f32    running cell state across time tiles
    """
    TS, TB, Din = x_ref.shape
    H = c_last_ref.shape[2]
    ti = pl.program_id(1)

    # ---- phase 1 (parallel over time): bf16 MXU matmul + gate math --------
    x = x_ref[...].reshape(TS * TB, Din)                       # bf16
    y = jax.lax.dot_general(
        x, w_ref[...], (((1,), (0,)), ((), ())),
        preferred_element_type=jnp.float32,
    ) + b_ref[...]                                             # (TS*TB, 3H) f32
    # NOTE: H is a multiple of 128 in the demo so these lane slices are
    # tile-aligned; for general H prefer three separate weight slabs.
    z = jnp.tanh(y[:, :H])
    f = jax.nn.sigmoid(y[:, H:2 * H])
    o = jax.nn.sigmoid(y[:, 2 * H:])
    fz_scr[...] = (f * z).reshape(TS, TB, H)
    omf_scr[...] = (1.0 - f).reshape(TS, TB, H)
    o_scr[...] = o.reshape(TS, TB, H)

    # ---- phase 2 (serial): forget-mult, cell state kept in registers ------
    @pl.when(ti == 0)
    def _():
        # hidden_init=None  <=>  c_{-1} = 0 (reset at the start of each
        # batch tile's time sweep).
        c_state[...] = jnp.zeros_like(c_state)

    def step(t, c):
        c = fz_scr[t] + omf_scr[t] * c          # 1 FMA + 1 mul per step
        cseq_scr[t] = c
        return c

    unroll = True if TS <= 8 else 8
    c_fin = jax.lax.fori_loop(0, TS, step, c_state[...], unroll=unroll)
    c_state[...] = c_fin

    # ---- phase 3 (parallel): output gate + lane-dense stores --------------
    h_ref[...] = (o_scr[...] * cseq_scr[...]).astype(h_ref.dtype)
    c_last_ref[0] = c_fin.astype(c_last_ref.dtype)


def _largest_divisor_leq(n, cap):
    cap = max(1, min(n, cap))
    for d in range(cap, 0, -1):
        if n % d == 0:
            return d
    return 1


def qrnn_layer(x, w, b, hidden_size, *, time_tile=None, batch_tile=None):
    """Run one QRNN layer. x: (S, B, Din) -> (H_seq (S,B,H), C_last (1,B,H))."""
    S, B, Din = x.shape
    H = hidden_size
    out_dtype = x.dtype

    # Batch tile: split in two when it stays a multiple of 8 (feeds the two
    # TensorCores on v7x via the "parallel" grid axis); otherwise one block.
    if batch_tile is None:
        TB = B // 2 if (B >= 16 and B % 16 == 0) else B
    else:
        TB = batch_tile
    assert B % TB == 0 and (TB == B or TB % 8 == 0), "bad batch tile"

    # Time tile: largest divisor of S whose f32 gate scratch stays modest so
    # the per-tile working set fits comfortably in VMEM on all generations.
    if time_tile is None:
        cap = max(1, min(S, 64, (8 * 1024 * 1024) // max(1, 16 * TB * H)))
        TS = _largest_divisor_leq(S, cap)
    else:
        TS = time_tile
    assert S % TS == 0, "time_tile must divide seq_len"

    nb, nt = B // TB, S // TS

    # bf16 MXU inputs, f32 accumulation (halves HBM/VMEM traffic for X and W).
    x_bf = x.astype(jnp.bfloat16)
    w_bf = w.astype(jnp.bfloat16)
    b_f32 = b.astype(jnp.float32)

    itemsize = jnp.dtype(out_dtype).itemsize
    tile_bytes = (
        2 * TS * TB * Din * 2          # x tile, bf16, double-buffered
        + 2 * Din * 3 * H * 2          # weight, bf16
        + 2 * 3 * H * 4                # bias, f32
        + 2 * TS * TB * H * itemsize   # h tile, double-buffered
        + 2 * TB * H * itemsize        # c_last tile
        + 4 * TS * TB * H * 4          # fz / omf / o / cseq scratch
        + TB * H * 4                   # c_state scratch
    )
    vmem_limit = int(min(64 * 1024 * 1024, max(4 * 1024 * 1024, 2 * tile_bytes)))

    cost = pl.CostEstimate(
        flops=2 * S * B * Din * 3 * H,
        transcendentals=3 * S * B * H,
        bytes_accessed=(x_bf.size * 2 + w_bf.size * 2 + b_f32.size * 4
                        + S * B * H * itemsize + B * H * itemsize),
    )

    h_seq, c_last = pl.pallas_call(
        _qrnn_layer_kernel,
        out_shape=(
            jax.ShapeDtypeStruct((S, B, H), out_dtype),
            jax.ShapeDtypeStruct((1, B, H), out_dtype),
        ),
        grid=(nb, nt),
        in_specs=[
            pl.BlockSpec((TS, TB, Din), lambda bi, ti: (ti, bi, 0)),
            pl.BlockSpec((Din, 3 * H), lambda bi, ti: (0, 0)),
            pl.BlockSpec((1, 3 * H), lambda bi, ti: (0, 0)),
        ],
        out_specs=(
            pl.BlockSpec((TS, TB, H), lambda bi, ti: (ti, bi, 0)),
            pl.BlockSpec((1, TB, H), lambda bi, ti: (0, bi, 0)),
        ),
        scratch_shapes=[
            pltpu.VMEM((TS, TB, H), jnp.float32),   # F*Z
            pltpu.VMEM((TS, TB, H), jnp.float32),   # 1-F
            pltpu.VMEM((TS, TB, H), jnp.float32),   # sigmoid(O)
            pltpu.VMEM((TS, TB, H), jnp.float32),   # C_t sequence
            pltpu.VMEM((TB, H), jnp.float32),       # running cell state
        ],
        compiler_params=pltpu.CompilerParams(
            dimension_semantics=("parallel", "arbitrary"),
            vmem_limit_bytes=vmem_limit,
        ),
        cost_estimate=cost,
    )(x_bf, w_bf, b_f32)
    return h_seq, c_last


@functools.partial(
    jax.jit, static_argnames=("hidden_size", "time_tile", "batch_tile"))
def qrnn_forward(x, weights, biases, hidden_size, time_tile=None,
                 batch_tile=None):
    """QRNN.forward with hidden=None.

    x       : (S, B, input_size)
    weights : tuple of (Din_l, 3H) arrays, one per layer
    biases  : tuple of (1, 3H) arrays, one per layer
    returns : (output (S, B, H), next_hidden (num_layers, B, H))
    """
    next_hidden = []
    inp = x
    for w, b in zip(weights, biases):
        inp, c_last = qrnn_layer(inp, w, b, hidden_size,
                                 time_tile=time_tile, batch_tile=batch_tile)
        next_hidden.append(c_last)
    next_hidden = jnp.concatenate(next_hidden, axis=0)  # (num_layers, B, H)
    return inp, next_hidden


def qrnn_reference(x, weights, biases, hidden_size):
    """Pure-JAX reference mirroring the kernel numerics (bf16 matmul inputs)."""
    H = hidden_size
    inp = x
    last = []
    for w, b in zip(weights, biases):
        y = jnp.einsum(
            "sbd,dk->sbk",
            inp.astype(jnp.bfloat16), w.astype(jnp.bfloat16),
            preferred_element_type=jnp.float32,
        ) + b.astype(jnp.float32)[0]
        z = jnp.tanh(y[..., :H])
        f = jax.nn.sigmoid(y[..., H:2 * H])
        o = jax.nn.sigmoid(y[..., 2 * H:])

        def step(c, zf):
            z_t, f_t = zf
            c = f_t * z_t + (1.0 - f_t) * c
            return c, c

        c0 = jnp.zeros((inp.shape[1], H), jnp.float32)
        c_fin, c_seq = jax.lax.scan(step, c0, (z, f))
        h = o * c_seq
        last.append(c_fin[None].astype(x.dtype))
        inp = h.astype(x.dtype)
    return inp, jnp.concatenate(last, axis=0)


def init_qrnn_params(key, input_size, hidden_size, num_layers):
    """Deterministic init mirroring nn.Linear(window*in, 3*hidden) per layer."""
    weights, biases = [], []
    for l in range(num_layers):
        d_in = input_size if l == 0 else hidden_size
        bound = 1.0 / (d_in ** 0.5)
        key, kw, kb = jax.random.split(key, 3)
        w = jax.random.uniform(
            kw, (d_in, 3 * hidden_size), jnp.float32, -bound, bound)
        b = jax.random.uniform(
            kb, (1, 3 * hidden_size), jnp.float32, -bound, bound)
        weights.append(w)
        biases.append(b)
    return tuple(weights), tuple(biases)


if __name__ == "__main__":
    seq_len, batch = 16, 16
    input_size, hidden_size, num_layers = 128, 128, 2

    key = jax.random.PRNGKey(0)
    key, kx = jax.random.split(key)
    x = jax.random.normal(kx, (seq_len, batch, input_size), jnp.float32)

    weights, biases = init_qrnn_params(key, input_size, hidden_size, num_layers)

    # time_tile=8 / auto batch_tile=8 -> grid (2, 2): exercises both the
    # cross-time-tile cell-state carry and the parallel batch axis.
    out, hn = qrnn_forward(x, weights, biases, hidden_size, time_tile=8)
    out, hn = jax.block_until_ready((out, hn))

    assert out.shape == (seq_len, batch, hidden_size)
    assert hn.shape == (num_layers, batch, hidden_size)
    assert bool(jnp.all(jnp.isfinite(out))) and bool(jnp.all(jnp.isfinite(hn)))

    ref_out, ref_hn = qrnn_reference(x, weights, biases, hidden_size)
    assert jnp.allclose(out, ref_out, rtol=2e-2, atol=2e-2), float(
        jnp.max(jnp.abs(out - ref_out)))
    assert jnp.allclose(hn, ref_hn, rtol=2e-2, atol=2e-2), float(
        jnp.max(jnp.abs(hn - ref_hn)))

    print("KERNEL_OK")
</pallas_src>

<mosaic_0001>
module attributes {stable_mosaic.version = 11 : i64} {
  func.func @_qrnn_layer_kernel(%arg0: i32, %arg1: i32, %arg2: memref<8x8x128xbf16, #tpu.memory_space<vmem>>, %arg3: memref<128x384xbf16, #tpu.memory_space<vmem>>, %arg4: memref<1x384xf32, #tpu.memory_space<vmem>>, %arg5: memref<8x8x128xf32, #tpu.memory_space<vmem>>, %arg6: memref<1x8x128xf32, #tpu.memory_space<vmem>>, %arg7: memref<8x8x128xf32, #tpu.memory_space<vmem>>, %arg8: memref<8x8x128xf32, #tpu.memory_space<vmem>>, %arg9: memref<8x8x128xf32, #tpu.memory_space<vmem>>, %arg10: memref<8x8x128xf32, #tpu.memory_space<vmem>>, %arg11: memref<8x128xf32, #tpu.memory_space<vmem>>) attributes {dimension_semantics = [#tpu.dimension_semantics<parallel>, #tpu.dimension_semantics<arbitrary>], iteration_bounds = array<i64: 2, 2>, scalar_prefetch = 0 : i64, scratch_operands = 5 : i64, tpu.core_type = #tpu.core_type<tc>, window_params = [{transform_indices = @transform_0, window_bounds = array<i64: 8, 8, 128>}, {pipeline_mode = #tpu.pipeline_mode<synchronous>, transform_indices = @transform_1, window_bounds = array<i64: 128, 384>}, {pipeline_mode = #tpu.pipeline_mode<synchronous>, transform_indices = @transform_2, window_bounds = array<i64: 1, 384>}, {transform_indices = @transform_3, window_bounds = array<i64: 8, 8, 128>}, {transform_indices = @transform_4, window_bounds = array<i64: 1, 8, 128>}]} {
    %c0 = arith.constant 0 : index
    %c0_0 = arith.constant 0 : index
    %c0_1 = arith.constant 0 : index
    %0 = vector.load %arg2[%c0, %c0_0, %c0_1] : memref<8x8x128xbf16, #tpu.memory_space<vmem>>, vector<8x8x128xbf16>
    %1 = vector.shape_cast %0 : vector<8x8x128xbf16> to vector<64x128xbf16>
    %c0_2 = arith.constant 0 : index
    %c0_3 = arith.constant 0 : index
    %2 = vector.load %arg3[%c0_2, %c0_3] : memref<128x384xbf16, #tpu.memory_space<vmem>>, vector<128x384xbf16>
    %cst = arith.constant dense<0.000000e+00> : vector<64x384xf32>
    %3 = tpu.matmul %1, %2, %cst {dimension_numbers = #tpu.dot_dimension_numbers<[1], [0], [0], [1], [0, 0, 1, 1], [], []>} : vector<64x128xbf16>, vector<128x384xbf16>, vector<64x384xf32> -> vector<64x384xf32>
    %c0_4 = arith.constant 0 : index
    %c0_5 = arith.constant 0 : index
    %4 = vector.load %arg4[%c0_4, %c0_5] : memref<1x384xf32, #tpu.memory_space<vmem>>, vector<1x384xf32>
    %5 = vector.broadcast %4 : vector<1x384xf32> to vector<64x384xf32>
    %6 = arith.addf %3, %5 : vector<64x384xf32>
    %7 = vector.extract_strided_slice %6 {offsets = [0, 0], sizes = [64, 128], strides = [1, 1]} : vector<64x384xf32> to vector<64x128xf32>
    %8 = math.tanh %7 : vector<64x128xf32>
    %9 = vector.extract_strided_slice %6 {offsets = [0, 128], sizes = [64, 128], strides = [1, 1]} : vector<64x384xf32> to vector<64x128xf32>
    %10 = arith.negf %9 : vector<64x128xf32>
    %11 = math.exp %10 : vector<64x128xf32>
    %cst_6 = arith.constant 1.000000e+00 : f32
    %12 = vector.broadcast %cst_6 : f32 to vector<64x128xf32>
    %13 = arith.addf %12, %11 : vector<64x128xf32>
    %14 = arith.divf %12, %13 : vector<64x128xf32>
    %15 = vector.extract_strided_slice %6 {offsets = [0, 256], sizes = [64, 128], strides = [1, 1]} : vector<64x384xf32> to vector<64x128xf32>
    %16 = arith.negf %15 : vector<64x128xf32>
    %17 = math.exp %16 : vector<64x128xf32>
    %cst_7 = arith.constant 1.000000e+00 : f32
    %18 = vector.broadcast %cst_7 : f32 to vector<64x128xf32>
    %19 = arith.addf %18, %17 : vector<64x128xf32>
    %20 = arith.divf %18, %19 : vector<64x128xf32>
    %21 = arith.mulf %14, %8 : vector<64x128xf32>
    %22 = vector.shape_cast %21 : vector<64x128xf32> to vector<8x8x128xf32>
    %c0_8 = arith.constant 0 : index
    %c0_9 = arith.constant 0 : index
    %c0_10 = arith.constant 0 : index
    %23 = vector.load %arg7[%c0_8, %c0_9, %c0_10] : memref<8x8x128xf32, #tpu.memory_space<vmem>>, vector<8x8x128xf32>
    tpu.vector_store %arg7[%c0_8, %c0_9, %c0_10], %22 {strides = array<i32>} : memref<8x8x128xf32, #tpu.memory_space<vmem>>, vector<8x8x128xf32>,
    %cst_11 = arith.constant 1.000000e+00 : f32
    %24 = vector.broadcast %cst_11 : f32 to vector<64x128xf32>
    %25 = arith.subf %24, %14 : vector<64x128xf32>
    %26 = vector.shape_cast %25 : vector<64x128xf32> to vector<8x8x128xf32>
    %c0_12 = arith.constant 0 : index
    %c0_13 = arith.constant 0 : index
    %c0_14 = arith.constant 0 : index
    %27 = vector.load %arg8[%c0_12, %c0_13, %c0_14] : memref<8x8x128xf32, #tpu.memory_space<vmem>>, vector<8x8x128xf32>
    tpu.vector_store %arg8[%c0_12, %c0_13, %c0_14], %26 {strides = array<i32>} : memref<8x8x128xf32, #tpu.memory_space<vmem>>, vector<8x8x128xf32>,
    %28 = vector.shape_cast %20 : vector<64x128xf32> to vector<8x8x128xf32>
    %c0_15 = arith.constant 0 : index
    %c0_16 = arith.constant 0 : index
    %c0_17 = arith.constant 0 : index
    %29 = vector.load %arg9[%c0_15, %c0_16, %c0_17] : memref<8x8x128xf32, #tpu.memory_space<vmem>>, vector<8x8x128xf32>
    tpu.vector_store %arg9[%c0_15, %c0_16, %c0_17], %28 {strides = array<i32>} : memref<8x8x128xf32, #tpu.memory_space<vmem>>, vector<8x8x128xf32>,
    %c0_i32 = arith.constant 0 : i32
    %30 = arith.cmpi eq, %arg1, %c0_i32 : i32
    %31 = arith.extui %30 : i1 to i32
    %c0_i32_18 = arith.constant 0 : i32
    %32 = arith.cmpi ne, %31, %c0_i32_18 : i32
    scf.if %32 {
      %cst_84 = arith.constant 0.000000e+00 : f32
      %138 = vector.broadcast %cst_84 : f32 to vector<8x128xf32>
      %c0_85 = arith.constant 0 : index
      %c0_86 = arith.constant 0 : index
      %139 = vector.load %arg11[%c0_85, %c0_86] : memref<8x128xf32, #tpu.memory_space<vmem>>, vector<8x128xf32>
      tpu.vector_store %arg11[%c0_85, %c0_86], %138 {strides = array<i32>} : memref<8x128xf32, #tpu.memory_space<vmem>>, vector<8x128xf32>,
    } else {
    }
    %c0_19 = arith.constant 0 : index
    %c0_20 = arith.constant 0 : index
    %33 = vector.load %arg11[%c0_19, %c0_20] : memref<8x128xf32, #tpu.memory_space<vmem>>, vector<8x128xf32>
    %c0_i32_21 = arith.constant 0 : i32
    %34 = arith.index_cast %c0_i32_21 : i32 to index
    %c0_22 = arith.constant 0 : index
    %c0_23 = arith.constant 0 : index
    %35 = vector.load %arg7[%34, %c0_22, %c0_23] : memref<8x8x128xf32, #tpu.memory_space<vmem>>, vector<1x8x128xf32>
    %36 = vector.shape_cast %35 : vector<1x8x128xf32> to vector<8x128xf32>
    %37 = arith.index_cast %c0_i32_21 : i32 to index
    %c0_24 = arith.constant 0 : index
    %c0_25 = arith.constant 0 : index
    %38 = vector.load %arg8[%37, %c0_24, %c0_25] : memref<8x8x128xf32, #tpu.memory_space<vmem>>, vector<1x8x128xf32>
    %39 = vector.shape_cast %38 : vector<1x8x128xf32> to vector<8x128xf32>
    %40 = arith.mulf %39, %33 : vector<8x128xf32>
    %41 = arith.addf %36, %40 : vector<8x128xf32>
    %42 = arith.index_cast %c0_i32_21 : i32 to index
    %c0_26 = arith.constant 0 : index
    %c0_27 = arith.constant 0 : index
    %43 = vector.load %arg10[%42, %c0_26, %c0_27] : memref<8x8x128xf32, #tpu.memory_space<vmem>>, vector<1x8x128xf32>
    %44 = vector.shape_cast %43 : vector<1x8x128xf32> to vector<8x128xf32>
    %45 = vector.shape_cast %41 : vector<8x128xf32> to vector<1x8x128xf32>
    tpu.vector_store %arg10[%42, %c0_26, %c0_27], %45 {strides = array<i32>} : memref<8x8x128xf32, #tpu.memory_space<vmem>>, vector<1x8x128xf32>,
    %c1_i32 = arith.constant 1 : i32
    %46 = arith.index_cast %c1_i32 : i32 to index
    %c0_28 = arith.constant 0 : index
    %c0_29 = arith.constant 0 : index
    %47 = vector.load %arg7[%46, %c0_28, %c0_29] : memref<8x8x128xf32, #tpu.memory_space<vmem>>, vector<1x8x128xf32>
    %48 = vector.shape_cast %47 : vector<1x8x128xf32> to vector<8x128xf32>
    %49 = arith.index_cast %c1_i32 : i32 to index
    %c0_30 = arith.constant 0 : index
    %c0_31 = arith.constant 0 : index
    %50 = vector.load %arg8[%49, %c0_30, %c0_31] : memref<8x8x128xf32, #tpu.memory_space<vmem>>, vector<1x8x128xf32>
    %51 = vector.shape_cast %50 : vector<1x8x128xf32> to vector<8x128xf32>
    %52 = arith.mulf %51, %41 : vector<8x128xf32>
    %53 = arith.addf %48, %52 : vector<8x128xf32>
    %54 = arith.index_cast %c1_i32 : i32 to index
    %c0_32 = arith.constant 0 : index
    %c0_33 = arith.constant 0 : index
    %55 = vector.load %arg10[%54, %c0_32, %c0_33] : memref<8x8x128xf32, #tpu.memory_space<vmem>>, vector<1x8x128xf32>
    %56 = vector.shape_cast %55 : vector<1x8x128xf32> to vector<8x128xf32>
    %57 = vector.shape_cast %53 : vector<8x128xf32> to vector<1x8x128xf32>
    tpu.vector_store %arg10[%54, %c0_32, %c0_33], %57 {strides = array<i32>} : memref<8x8x128xf32, #tpu.memory_space<vmem>>, vector<1x8x128xf32>,
    %c2_i32 = arith.constant 2 : i32
    %58 = arith.index_cast %c2_i32 : i32 to index
    %c0_34 = arith.constant 0 : index
    %c0_35 = arith.constant 0 : index
    %59 = vector.load %arg7[%58, %c0_34, %c0_35] : memref<8x8x128xf32, #tpu.memory_space<vmem>>, vector<1x8x128xf32>
    %60 = vector.shape_cast %59 : vector<1x8x128xf32> to vector<8x128xf32>
    %61 = arith.index_cast %c2_i32 : i32 to index
    %c0_36 = arith.constant 0 : index
    %c0_37 = arith.constant 0 : index
    %62 = vector.load %arg8[%61, %c0_36, %c0_37] : memref<8x8x128xf32, #tpu.memory_space<vmem>>, vector<1x8x128xf32>
    %63 = vector.shape_cast %62 : vector<1x8x128xf32> to vector<8x128xf32>
    %64 = arith.mulf %63, %53 : vector<8x128xf32>
    %65 = arith.addf %60, %64 : vector<8x128xf32>
    %66 = arith.index_cast %c2_i32 : i32 to index
    %c0_38 = arith.constant 0 : index
    %c0_39 = arith.constant 0 : index
    %67 = vector.load %arg10[%66, %c0_38, %c0_39] : memref<8x8x128xf32, #tpu.memory_space<vmem>>, vector<1x8x128xf32>
    %68 = vector.shape_cast %67 : vector<1x8x128xf32> to vector<8x128xf32>
    %69 = vector.shape_cast %65 : vector<8x128xf32> to vector<1x8x128xf32>
    tpu.vector_store %arg10[%66, %c0_38, %c0_39], %69 {strides = array<i32>} : memref<8x8x128xf32, #tpu.memory_space<vmem>>, vector<1x8x128xf32>,
    %c3_i32 = arith.constant 3 : i32
    %70 = arith.index_cast %c3_i32 : i32 to index
    %c0_40 = arith.constant 0 : index
    %c0_41 = arith.constant 0 : index
    %71 = vector.load %arg7[%70, %c0_40, %c0_41] : memref<8x8x128xf32, #tpu.memory_space<vmem>>, vector<1x8x128xf32>
    %72 = vector.shape_cast %71 : vector<1x8x128xf32> to vector<8x128xf32>
    %73 = arith.index_cast %c3_i32 : i32 to index
    %c0_42 = arith.constant 0 : index
    %c0_43 = arith.constant 0 : index
    %74 = vector.load %arg8[%73, %c0_42, %c0_43] : memref<8x8x128xf32, #tpu.memory_space<vmem>>, vector<1x8x128xf32>
    %75 = vector.shape_cast %74 : vector<1x8x128xf32> to vector<8x128xf32>
    %76 = arith.mulf %75, %65 : vector<8x128xf32>
    %77 = arith.addf %72, %76 : vector<8x128xf32>
    %78 = arith.index_cast %c3_i32 : i32 to index
    %c0_44 = arith.constant 0 : index
    %c0_45 = arith.constant 0 : index
    %79 = vector.load %arg10[%78, %c0_44, %c0_45] : memref<8x8x128xf32, #tpu.memory_space<vmem>>, vector<1x8x128xf32>
    %80 = vector.shape_cast %79 : vector<1x8x128xf32> to vector<8x128xf32>
    %81 = vector.shape_cast %77 : vector<8x128xf32> to vector<1x8x128xf32>
    tpu.vector_store %arg10[%78, %c0_44, %c0_45], %81 {strides = array<i32>} : memref<8x8x128xf32, #tpu.memory_space<vmem>>, vector<1x8x128xf32>,
    %c4_i32 = arith.constant 4 : i32
    %82 = arith.index_cast %c4_i32 : i32 to index
    %c0_46 = arith.constant 0 : index
    %c0_47 = arith.constant 0 : index
    %83 = vector.load %arg7[%82, %c0_46, %c0_47] : memref<8x8x128xf32, #tpu.memory_space<vmem>>, vector<1x8x128xf32>
    %84 = vector.shape_cast %83 : vector<1x8x128xf32> to vector<8x128xf32>
    %85 = arith.index_cast %c4_i32 : i32 to index
    %c0_48 = arith.constant 0 : index
    %c0_49 = arith.constant 0 : index
    %86 = vector.load %arg8[%85, %c0_48, %c0_49] : memref<8x8x128xf32, #tpu.memory_space<vmem>>, vector<1x8x128xf32>
    %87 = vector.shape_cast %86 : vector<1x8x128xf32> to vector<8x128xf32>
    %88 = arith.mulf %87, %77 : vector<8x128xf32>
    %89 = arith.addf %84, %88 : vector<8x128xf32>
    %90 = arith.index_cast %c4_i32 : i32 to index
    %c0_50 = arith.constant 0 : index
    %c0_51 = arith.constant 0 : index
    %91 = vector.load %arg10[%90, %c0_50, %c0_51] : memref<8x8x128xf32, #tpu.memory_space<vmem>>, vector<1x8x128xf32>
    %92 = vector.shape_cast %91 : vector<1x8x128xf32> to vector<8x128xf32>
    %93 = vector.shape_cast %89 : vector<8x128xf32> to vector<1x8x128xf32>
    tpu.vector_store %arg10[%90, %c0_50, %c0_51], %93 {strides = array<i32>} : memref<8x8x128xf32, #tpu.memory_space<vmem>>, vector<1x8x128xf32>,
    %c5_i32 = arith.constant 5 : i32
    %94 = arith.index_cast %c5_i32 : i32 to index
    %c0_52 = arith.constant 0 : index
    %c0_53 = arith.constant 0 : index
    %95 = vector.load %arg7[%94, %c0_52, %c0_53] : memref<8x8x128xf32, #tpu.memory_space<vmem>>, vector<1x8x128xf32>
    %96 = vector.shape_cast %95 : vector<1x8x128xf32> to vector<8x128xf32>
    %97 = arith.index_cast %c5_i32 : i32 to index
    %c0_54 = arith.constant 0 : index
    %c0_55 = arith.constant 0 : index
    %98 = vector.load %arg8[%97, %c0_54, %c0_55] : memref<8x8x128xf32, #tpu.memory_space<vmem>>, vector<1x8x128xf32>
    %99 = vector.shape_cast %98 : vector<1x8x128xf32> to vector<8x128xf32>
    %100 = arith.mulf %99, %89 : vector<8x128xf32>
    %101 = arith.addf %96, %100 : vector<8x128xf32>
    %102 = arith.index_cast %c5_i32 : i32 to index
    %c0_56 = arith.constant 0 : index
    %c0_57 = arith.constant 0 : index
    %103 = vector.load %arg10[%102, %c0_56, %c0_57] : memref<8x8x128xf32, #tpu.memory_space<vmem>>, vector<1x8x128xf32>
    %104 = vector.shape_cast %103 : vector<1x8x128xf32> to vector<8x128xf32>
    %105 = vector.shape_cast %101 : vector<8x128xf32> to vector<1x8x128xf32>
    tpu.vector_store %arg10[%102, %c0_56, %c0_57], %105 {strides = array<i32>} : memref<8x8x128xf32, #tpu.memory_space<vmem>>, vector<1x8x128xf32>,
    %c6_i32 = arith.constant 6 : i32
    %106 = arith.index_cast %c6_i32 : i32 to index
    %c0_58 = arith.constant 0 : index
    %c0_59 = arith.constant 0 : index
    %107 = vector.load %arg7[%106, %c0_58, %c0_59] : memref<8x8x128xf32, #tpu.memory_space<vmem>>, vector<1x8x128xf32>
    %108 = vector.shape_cast %107 : vector<1x8x128xf32> to vector<8x128xf32>
    %109 = arith.index_cast %c6_i32 : i32 to index
    %c0_60 = arith.constant 0 : index
    %c0_61 = arith.constant 0 : index
    %110 = vector.load %arg8[%109, %c0_60, %c0_61] : memref<8x8x128xf32, #tpu.memory_space<vmem>>, vector<1x8x128xf32>
    %111 = vector.shape_cast %110 : vector<1x8x128xf32> to vector<8x128xf32>
    %112 = arith.mulf %111, %101 : vector<8x128xf32>
    %113 = arith.addf %108, %112 : vector<8x128xf32>
    %114 = arith.index_cast %c6_i32 : i32 to index
    %c0_62 = arith.constant 0 : index
    %c0_63 = arith.constant 0 : index
    %115 = vector.load %arg10[%114, %c0_62, %c0_63] : memref<8x8x128xf32, #tpu.memory_space<vmem>>, vector<1x8x128xf32>
    %116 = vector.shape_cast %115 : vector<1x8x128xf32> to vector<8x128xf32>
    %117 = vector.shape_cast %113 : vector<8x128xf32> to vector<1x8x128xf32>
    tpu.vector_store %arg10[%114, %c0_62, %c0_63], %117 {strides = array<i32>} : memref<8x8x128xf32, #tpu.memory_space<vmem>>, vector<1x8x128xf32>,
    %c7_i32 = arith.constant 7 : i32
    %118 = arith.index_cast %c7_i32 : i32 to index
    %c0_64 = arith.constant 0 : index
    %c0_65 = arith.constant 0 : index
    %119 = vector.load %arg7[%118, %c0_64, %c0_65] : memref<8x8x128xf32, #tpu.memory_space<vmem>>, vector<1x8x128xf32>
    %120 = vector.shape_cast %119 : vector<1x8x128xf32> to vector<8x128xf32>
    %121 = arith.index_cast %c7_i32 : i32 to index
    %c0_66 = arith.constant 0 : index
    %c0_67 = arith.constant 0 : index
    %122 = vector.load %arg8[%121, %c0_66, %c0_67] : memref<8x8x128xf32, #tpu.memory_space<vmem>>, vector<1x8x128xf32>
    %123 = vector.shape_cast %122 : vector<1x8x128xf32> to vector<8x128xf32>
    %124 = arith.mulf %123, %113 : vector<8x128xf32>
    %125 = arith.addf %120, %124 : vector<8x128xf32>
    %126 = arith.index_cast %c7_i32 : i32 to index
    %c0_68 = arith.constant 0 : index
    %c0_69 = arith.constant 0 : index
    %127 = vector.load %arg10[%126, %c0_68, %c0_69] : memref<8x8x128xf32, #tpu.memory_space<vmem>>, vector<1x8x128xf32>
    %128 = vector.shape_cast %127 : vector<1x8x128xf32> to vector<8x128xf32>
    %129 = vector.shape_cast %125 : vector<8x128xf32> to vector<1x8x128xf32>
    tpu.vector_store %arg10[%126, %c0_68, %c0_69], %129 {strides = array<i32>} : memref<8x8x128xf32, #tpu.memory_space<vmem>>, vector<1x8x128xf32>,
    %c8_i32 = arith.constant 8 : i32
    %c0_70 = arith.constant 0 : index
    %c0_71 = arith.constant 0 : index
    %130 = vector.load %arg11[%c0_70, %c0_71] : memref<8x128xf32, #tpu.memory_space<vmem>>, vector<8x128xf32>
    tpu.vector_store %arg11[%c0_70, %c0_71], %125 {strides = array<i32>} : memref<8x128xf32, #tpu.memory_space<vmem>>, vector<8x128xf32>,
    %c0_72 = arith.constant 0 : index
    %c0_73 = arith.constant 0 : index
    %c0_74 = arith.constant 0 : index
    %131 = vector.load %arg9[%c0_72, %c0_73, %c0_74] : memref<8x8x128xf32, #tpu.memory_space<vmem>>, vector<8x8x128xf32>
    %c0_75 = arith.constant 0 : index
    %c0_76 = arith.constant 0 : index
    %c0_77 = arith.constant 0 : index
    %132 = vector.load %arg10[%c0_75, %c0_76, %c0_77] : memref<8x8x128xf32, #tpu.memory_space<vmem>>, vector<8x8x128xf32>
    %133 = arith.mulf %131, %132 : vector<8x8x128xf32>
    %c0_78 = arith.constant 0 : index
    %c0_79 = arith.constant 0 : index
    %c0_80 = arith.constant 0 : index
    %134 = vector.load %arg5[%c0_78, %c0_79, %c0_80] : memref<8x8x128xf32, #tpu.memory_space<vmem>>, vector<8x8x128xf32>
    tpu.vector_store %arg5[%c0_78, %c0_79, %c0_80], %133 {strides = array<i32>} : memref<8x8x128xf32, #tpu.memory_space<vmem>>, vector<8x8x128xf32>,
    %c0_81 = arith.constant 0 : index
    %c0_82 = arith.constant 0 : index
    %c0_83 = arith.constant 0 : index
    %135 = vector.load %arg6[%c0_81, %c0_82, %c0_83] : memref<1x8x128xf32, #tpu.memory_space<vmem>>, vector<1x8x128xf32>
    %136 = vector.shape_cast %135 : vector<1x8x128xf32> to vector<8x128xf32>
    %137 = vector.shape_cast %125 : vector<8x128xf32> to vector<1x8x128xf32>
    tpu.vector_store %arg6[%c0_81, %c0_82, %c0_83], %137 {strides = array<i32>} : memref<1x8x128xf32, #tpu.memory_space<vmem>>, vector<1x8x128xf32>,
    return
  }
  func.func @transform_0(%arg0: i32, %arg1: i32) -> (i32, i32, i32) {
    %c0_i32 = arith.constant 0 : i32
    %c0_i32_0 = arith.constant 0 : i32
    return %arg1, %arg0, %c0_i32 : i32, i32, i32
  }
  func.func @transform_1(%arg0: i32, %arg1: i32) -> (i32, i32) {
    %c0_i32 = arith.constant 0 : i32
    %c0_i32_0 = arith.constant 0 : i32
    %c0_i32_1 = arith.constant 0 : i32
    return %c0_i32, %c0_i32_0 : i32, i32
  }
  func.func @transform_2(%arg0: i32, %arg1: i32) -> (i32, i32) {
    %c0_i32 = arith.constant 0 : i32
    %c0_i32_0 = arith.constant 0 : i32
    %c0_i32_1 = arith.constant 0 : i32
    return %c0_i32, %c0_i32_0 : i32, i32
  }
  func.func @transform_3(%arg0: i32, %arg1: i32) -> (i32, i32, i32) {
    %c0_i32 = arith.constant 0 : i32
    %c0_i32_0 = arith.constant 0 : i32
    return %arg1, %arg0, %c0_i32 : i32, i32, i32
  }
  func.func @transform_4(%arg0: i32, %arg1: i32) -> (i32, i32, i32) {
    %c0_i32 = arith.constant 0 : i32
    %c0_i32_0 = arith.constant 0 : i32
    %c0_i32_1 = arith.constant 0 : i32
    return %c0_i32, %arg0, %c0_i32_0 : i32, i32, i32
  }
}

module attributes {stable_mosaic.version = 11 : i64} {
  func.func @_qrnn_layer_kernel(%arg0: i32, %arg1: i32, %arg2: memref<8x8x128xbf16, #tpu.memory_space<vmem>>, %arg3: memref<128x384xbf16, #tpu.memory_space<vmem>>, %arg4: memref<1x384xf32, #tpu.memory_space<vmem>>, %arg5: memref<8x8x128xf32, #tpu.memory_space<vmem>>, %arg6: memref<1x8x128xf32, #tpu.memory_space<vmem>>, %arg7: memref<8x8x128xf32, #tpu.memory_space<vmem>>, %arg8: memref<8x8x128xf32, #tpu.memory_space<vmem>>, %arg9: memref<8x8x128xf32, #tpu.memory_space<vmem>>, %arg10: memref<8x8x128xf32, #tpu.memory_space<vmem>>, %arg11: memref<8x128xf32, #tpu.memory_space<vmem>>) attributes {dimension_semantics = [#tpu.dimension_semantics<parallel>, #tpu.dimension_semantics<arbitrary>], iteration_bounds = array<i64: 2, 2>, scalar_prefetch = 0 : i64, scratch_operands = 5 : i64, tpu.core_type = #tpu.core_type<tc>, window_params = [{transform_indices = @transform_0, window_bounds = array<i64: 8, 8, 128>}, {pipeline_mode = #tpu.pipeline_mode<synchronous>, transform_indices = @transform_1, window_bounds = array<i64: 128, 384>}, {pipeline_mode = #tpu.pipeline_mode<synchronous>, transform_indices = @transform_2, window_bounds = array<i64: 1, 384>}, {transform_indices = @transform_3, window_bounds = array<i64: 8, 8, 128>}, {transform_indices = @transform_4, window_bounds = array<i64: 1, 8, 128>}]} {
    %c0 = arith.constant 0 : index
    %c0_0 = arith.constant 0 : index
    %c0_1 = arith.constant 0 : index
    %0 = vector.load %arg2[%c0, %c0_0, %c0_1] : memref<8x8x128xbf16, #tpu.memory_space<vmem>>, vector<8x8x128xbf16>
    %1 = vector.shape_cast %0 : vector<8x8x128xbf16> to vector<64x128xbf16>
    %c0_2 = arith.constant 0 : index
    %c0_3 = arith.constant 0 : index
    %2 = vector.load %arg3[%c0_2, %c0_3] : memref<128x384xbf16, #tpu.memory_space<vmem>>, vector<128x384xbf16>
    %cst = arith.constant dense<0.000000e+00> : vector<64x384xf32>
    %3 = tpu.matmul %1, %2, %cst {dimension_numbers = #tpu.dot_dimension_numbers<[1], [0], [0], [1], [0, 0, 1, 1], [], []>} : vector<64x128xbf16>, vector<128x384xbf16>, vector<64x384xf32> -> vector<64x384xf32>
    %c0_4 = arith.constant 0 : index
    %c0_5 = arith.constant 0 : index
    %4 = vector.load %arg4[%c0_4, %c0_5] : memref<1x384xf32, #tpu.memory_space<vmem>>, vector<1x384xf32>
    %5 = vector.broadcast %4 : vector<1x384xf32> to vector<64x384xf32>
    %6 = arith.addf %3, %5 : vector<64x384xf32>
    %7 = vector.extract_strided_slice %6 {offsets = [0, 0], sizes = [64, 128], strides = [1, 1]} : vector<64x384xf32> to vector<64x128xf32>
    %8 = math.tanh %7 : vector<64x128xf32>
    %9 = vector.extract_strided_slice %6 {offsets = [0, 128], sizes = [64, 128], strides = [1, 1]} : vector<64x384xf32> to vector<64x128xf32>
    %10 = arith.negf %9 : vector<64x128xf32>
    %11 = math.exp %10 : vector<64x128xf32>
    %cst_6 = arith.constant 1.000000e+00 : f32
    %12 = vector.broadcast %cst_6 : f32 to vector<64x128xf32>
    %13 = arith.addf %12, %11 : vector<64x128xf32>
    %14 = arith.divf %12, %13 : vector<64x128xf32>
    %15 = vector.extract_strided_slice %6 {offsets = [0, 256], sizes = [64, 128], strides = [1, 1]} : vector<64x384xf32> to vector<64x128xf32>
    %16 = arith.negf %15 : vector<64x128xf32>
    %17 = math.exp %16 : vector<64x128xf32>
    %cst_7 = arith.constant 1.000000e+00 : f32
    %18 = vector.broadcast %cst_7 : f32 to vector<64x128xf32>
    %19 = arith.addf %18, %17 : vector<64x128xf32>
    %20 = arith.divf %18, %19 : vector<64x128xf32>
    %21 = arith.mulf %14, %8 : vector<64x128xf32>
    %22 = vector.shape_cast %21 : vector<64x128xf32> to vector<8x8x128xf32>
    %c0_8 = arith.constant 0 : index
    %c0_9 = arith.constant 0 : index
    %c0_10 = arith.constant 0 : index
    %23 = vector.load %arg7[%c0_8, %c0_9, %c0_10] : memref<8x8x128xf32, #tpu.memory_space<vmem>>, vector<8x8x128xf32>
    tpu.vector_store %arg7[%c0_8, %c0_9, %c0_10], %22 {strides = array<i32>} : memref<8x8x128xf32, #tpu.memory_space<vmem>>, vector<8x8x128xf32>,
    %cst_11 = arith.constant 1.000000e+00 : f32
    %24 = vector.broadcast %cst_11 : f32 to vector<64x128xf32>
    %25 = arith.subf %24, %14 : vector<64x128xf32>
    %26 = vector.shape_cast %25 : vector<64x128xf32> to vector<8x8x128xf32>
    %c0_12 = arith.constant 0 : index
    %c0_13 = arith.constant 0 : index
    %c0_14 = arith.constant 0 : index
    %27 = vector.load %arg8[%c0_12, %c0_13, %c0_14] : memref<8x8x128xf32, #tpu.memory_space<vmem>>, vector<8x8x128xf32>
    tpu.vector_store %arg8[%c0_12, %c0_13, %c0_14], %26 {strides = array<i32>} : memref<8x8x128xf32, #tpu.memory_space<vmem>>, vector<8x8x128xf32>,
    %28 = vector.shape_cast %20 : vector<64x128xf32> to vector<8x8x128xf32>
    %c0_15 = arith.constant 0 : index
    %c0_16 = arith.constant 0 : index
    %c0_17 = arith.constant 0 : index
    %29 = vector.load %arg9[%c0_15, %c0_16, %c0_17] : memref<8x8x128xf32, #tpu.memory_space<vmem>>, vector<8x8x128xf32>
    tpu.vector_store %arg9[%c0_15, %c0_16, %c0_17], %28 {strides = array<i32>} : memref<8x8x128xf32, #tpu.memory_space<vmem>>, vector<8x8x128xf32>,
    %c0_i32 = arith.constant 0 : i32
    %30 = arith.cmpi eq, %arg1, %c0_i32 : i32
    %31 = arith.extui %30 : i1 to i32
    %c0_i32_18 = arith.constant 0 : i32
    %32 = arith.cmpi ne, %31, %c0_i32_18 : i32
    scf.if %32 {
      %cst_84 = arith.constant 0.000000e+00 : f32
      %138 = vector.broadcast %cst_84 : f32 to vector<8x128xf32>
      %c0_85 = arith.constant 0 : index
      %c0_86 = arith.constant 0 : index
      %139 = vector.load %arg11[%c0_85, %c0_86] : memref<8x128xf32, #tpu.memory_space<vmem>>, vector<8x128xf32>
      tpu.vector_store %arg11[%c0_85, %c0_86], %138 {strides = array<i32>} : memref<8x128xf32, #tpu.memory_space<vmem>>, vector<8x128xf32>,
    } else {
    }
    %c0_19 = arith.constant 0 : index
    %c0_20 = arith.constant 0 : index
    %33 = vector.load %arg11[%c0_19, %c0_20] : memref<8x128xf32, #tpu.memory_space<vmem>>, vector<8x128xf32>
    %c0_i32_21 = arith.constant 0 : i32
    %34 = arith.index_cast %c0_i32_21 : i32 to index
    %c0_22 = arith.constant 0 : index
    %c0_23 = arith.constant 0 : index
    %35 = vector.load %arg7[%34, %c0_22, %c0_23] : memref<8x8x128xf32, #tpu.memory_space<vmem>>, vector<1x8x128xf32>
    %36 = vector.shape_cast %35 : vector<1x8x128xf32> to vector<8x128xf32>
    %37 = arith.index_cast %c0_i32_21 : i32 to index
    %c0_24 = arith.constant 0 : index
    %c0_25 = arith.constant 0 : index
    %38 = vector.load %arg8[%37, %c0_24, %c0_25] : memref<8x8x128xf32, #tpu.memory_space<vmem>>, vector<1x8x128xf32>
    %39 = vector.shape_cast %38 : vector<1x8x128xf32> to vector<8x128xf32>
    %40 = arith.mulf %39, %33 : vector<8x128xf32>
    %41 = arith.addf %36, %40 : vector<8x128xf32>
    %42 = arith.index_cast %c0_i32_21 : i32 to index
    %c0_26 = arith.constant 0 : index
    %c0_27 = arith.constant 0 : index
    %43 = vector.load %arg10[%42, %c0_26, %c0_27] : memref<8x8x128xf32, #tpu.memory_space<vmem>>, vector<1x8x128xf32>
    %44 = vector.shape_cast %43 : vector<1x8x128xf32> to vector<8x128xf32>
    %45 = vector.shape_cast %41 : vector<8x128xf32> to vector<1x8x128xf32>
    tpu.vector_store %arg10[%42, %c0_26, %c0_27], %45 {strides = array<i32>} : memref<8x8x128xf32, #tpu.memory_space<vmem>>, vector<1x8x128xf32>,
    %c1_i32 = arith.constant 1 : i32
    %46 = arith.index_cast %c1_i32 : i32 to index
    %c0_28 = arith.constant 0 : index
    %c0_29 = arith.constant 0 : index
    %47 = vector.load %arg7[%46, %c0_28, %c0_29] : memref<8x8x128xf32, #tpu.memory_space<vmem>>, vector<1x8x128xf32>
    %48 = vector.shape_cast %47 : vector<1x8x128xf32> to vector<8x128xf32>
    %49 = arith.index_cast %c1_i32 : i32 to index
    %c0_30 = arith.constant 0 : index
    %c0_31 = arith.constant 0 : index
    %50 = vector.load %arg8[%49, %c0_30, %c0_31] : memref<8x8x128xf32, #tpu.memory_space<vmem>>, vector<1x8x128xf32>
    %51 = vector.shape_cast %50 : vector<1x8x128xf32> to vector<8x128xf32>
    %52 = arith.mulf %51, %41 : vector<8x128xf32>
    %53 = arith.addf %48, %52 : vector<8x128xf32>
    %54 = arith.index_cast %c1_i32 : i32 to index
    %c0_32 = arith.constant 0 : index
    %c0_33 = arith.constant 0 : index
    %55 = vector.load %arg10[%54, %c0_32, %c0_33] : memref<8x8x128xf32, #tpu.memory_space<vmem>>, vector<1x8x128xf32>
    %56 = vector.shape_cast %55 : vector<1x8x128xf32> to vector<8x128xf32>
    %57 = vector.shape_cast %53 : vector<8x128xf32> to vector<1x8x128xf32>
    tpu.vector_store %arg10[%54, %c0_32, %c0_33], %57 {strides = array<i32>} : memref<8x8x128xf32, #tpu.memory_space<vmem>>, vector<1x8x128xf32>,
    %c2_i32 = arith.constant 2 : i32
    %58 = arith.index_cast %c2_i32 : i32 to index
    %c0_34 = arith.constant 0 : index
    %c0_35 = arith.constant 0 : index
    %59 = vector.load %arg7[%58, %c0_34, %c0_35] : memref<8x8x128xf32, #tpu.memory_space<vmem>>, vector<1x8x128xf32>
    %60 = vector.shape_cast %59 : vector<1x8x128xf32> to vector<8x128xf32>
    %61 = arith.index_cast %c2_i32 : i32 to index
    %c0_36 = arith.constant 0 : index
    %c0_37 = arith.constant 0 : index
    %62 = vector.load %arg8[%61, %c0_36, %c0_37] : memref<8x8x128xf32, #tpu.memory_space<vmem>>, vector<1x8x128xf32>
    %63 = vector.shape_cast %62 : vector<1x8x128xf32> to vector<8x128xf32>
    %64 = arith.mulf %63, %53 : vector<8x128xf32>
    %65 = arith.addf %60, %64 : vector<8x128xf32>
    %66 = arith.index_cast %c2_i32 : i32 to index
    %c0_38 = arith.constant 0 : index
    %c0_39 = arith.constant 0 : index
    %67 = vector.load %arg10[%66, %c0_38, %c0_39] : memref<8x8x128xf32, #tpu.memory_space<vmem>>, vector<1x8x128xf32>
    %68 = vector.shape_cast %67 : vector<1x8x128xf32> to vector<8x128xf32>
    %69 = vector.shape_cast %65 : vector<8x128xf32> to vector<1x8x128xf32>
    tpu.vector_store %arg10[%66, %c0_38, %c0_39], %69 {strides = array<i32>} : memref<8x8x128xf32, #tpu.memory_space<vmem>>, vector<1x8x128xf32>,
    %c3_i32 = arith.constant 3 : i32
    %70 = arith.index_cast %c3_i32 : i32 to index
    %c0_40 = arith.constant 0 : index
    %c0_41 = arith.constant 0 : index
    %71 = vector.load %arg7[%70, %c0_40, %c0_41] : memref<8x8x128xf32, #tpu.memory_space<vmem>>, vector<1x8x128xf32>
    %72 = vector.shape_cast %71 : vector<1x8x128xf32> to vector<8x128xf32>
    %73 = arith.index_cast %c3_i32 : i32 to index
    %c0_42 = arith.constant 0 : index
    %c0_43 = arith.constant 0 : index
    %74 = vector.load %arg8[%73, %c0_42, %c0_43] : memref<8x8x128xf32, #tpu.memory_space<vmem>>, vector<1x8x128xf32>
    %75 = vector.shape_cast %74 : vector<1x8x128xf32> to vector<8x128xf32>
    %76 = arith.mulf %75, %65 : vector<8x128xf32>
    %77 = arith.addf %72, %76 : vector<8x128xf32>
    %78 = arith.index_cast %c3_i32 : i32 to index
    %c0_44 = arith.constant 0 : index
    %c0_45 = arith.constant 0 : index
    %79 = vector.load %arg10[%78, %c0_44, %c0_45] : memref<8x8x128xf32, #tpu.memory_space<vmem>>, vector<1x8x128xf32>
    %80 = vector.shape_cast %79 : vector<1x8x128xf32> to vector<8x128xf32>
    %81 = vector.shape_cast %77 : vector<8x128xf32> to vector<1x8x128xf32>
    tpu.vector_store %arg10[%78, %c0_44, %c0_45], %81 {strides = array<i32>} : memref<8x8x128xf32, #tpu.memory_space<vmem>>, vector<1x8x128xf32>,
    %c4_i32 = arith.constant 4 : i32
    %82 = arith.index_cast %c4_i32 : i32 to index
    %c0_46 = arith.constant 0 : index
    %c0_47 = arith.constant 0 : index
    %83 = vector.load %arg7[%82, %c0_46, %c0_47] : memref<8x8x128xf32, #tpu.memory_space<vmem>>, vector<1x8x128xf32>
    %84 = vector.shape_cast %83 : vector<1x8x128xf32> to vector<8x128xf32>
    %85 = arith.index_cast %c4_i32 : i32 to index
    %c0_48 = arith.constant 0 : index
    %c0_49 = arith.constant 0 : index
    %86 = vector.load %arg8[%85, %c0_48, %c0_49] : memref<8x8x128xf32, #tpu.memory_space<vmem>>, vector<1x8x128xf32>
    %87 = vector.shape_cast %86 : vector<1x8x128xf32> to vector<8x128xf32>
    %88 = arith.mulf %87, %77 : vector<8x128xf32>
    %89 = arith.addf %84, %88 : vector<8x128xf32>
    %90 = arith.index_cast %c4_i32 : i32 to index
    %c0_50 = arith.constant 0 : index
    %c0_51 = arith.constant 0 : index
    %91 = vector.load %arg10[%90, %c0_50, %c0_51] : memref<8x8x128xf32, #tpu.memory_space<vmem>>, vector<1x8x128xf32>
    %92 = vector.shape_cast %91 : vector<1x8x128xf32> to vector<8x128xf32>
    %93 = vector.shape_cast %89 : vector<8x128xf32> to vector<1x8x128xf32>
    tpu.vector_store %arg10[%90, %c0_50, %c0_51], %93 {strides = array<i32>} : memref<8x8x128xf32, #tpu.memory_space<vmem>>, vector<1x8x128xf32>,
    %c5_i32 = arith.constant 5 : i32
    %94 = arith.index_cast %c5_i32 : i32 to index
    %c0_52 = arith.constant 0 : index
    %c0_53 = arith.constant 0 : index
    %95 = vector.load %arg7[%94, %c0_52, %c0_53] : memref<8x8x128xf32, #tpu.memory_space<vmem>>, vector<1x8x128xf32>
    %96 = vector.shape_cast %95 : vector<1x8x128xf32> to vector<8x128xf32>
    %97 = arith.index_cast %c5_i32 : i32 to index
    %c0_54 = arith.constant 0 : index
    %c0_55 = arith.constant 0 : index
    %98 = vector.load %arg8[%97, %c0_54, %c0_55] : memref<8x8x128xf32, #tpu.memory_space<vmem>>, vector<1x8x128xf32>
    %99 = vector.shape_cast %98 : vector<1x8x128xf32> to vector<8x128xf32>
    %100 = arith.mulf %99, %89 : vector<8x128xf32>
    %101 = arith.addf %96, %100 : vector<8x128xf32>
    %102 = arith.index_cast %c5_i32 : i32 to index
    %c0_56 = arith.constant 0 : index
    %c0_57 = arith.constant 0 : index
    %103 = vector.load %arg10[%102, %c0_56, %c0_57] : memref<8x8x128xf32, #tpu.memory_space<vmem>>, vector<1x8x128xf32>
    %104 = vector.shape_cast %103 : vector<1x8x128xf32> to vector<8x128xf32>
    %105 = vector.shape_cast %101 : vector<8x128xf32> to vector<1x8x128xf32>
    tpu.vector_store %arg10[%102, %c0_56, %c0_57], %105 {strides = array<i32>} : memref<8x8x128xf32, #tpu.memory_space<vmem>>, vector<1x8x128xf32>,
    %c6_i32 = arith.constant 6 : i32
    %106 = arith.index_cast %c6_i32 : i32 to index
    %c0_58 = arith.constant 0 : index
    %c0_59 = arith.constant 0 : index
    %107 = vector.load %arg7[%106, %c0_58, %c0_59] : memref<8x8x128xf32, #tpu.memory_space<vmem>>, vector<1x8x128xf32>
    %108 = vector.shape_cast %107 : vector<1x8x128xf32> to vector<8x128xf32>
    %109 = arith.index_cast %c6_i32 : i32 to index
    %c0_60 = arith.constant 0 : index
    %c0_61 = arith.constant 0 : index
    %110 = vector.load %arg8[%109, %c0_60, %c0_61] : memref<8x8x128xf32, #tpu.memory_space<vmem>>, vector<1x8x128xf32>
    %111 = vector.shape_cast %110 : vector<1x8x128xf32> to vector<8x128xf32>
    %112 = arith.mulf %111, %101 : vector<8x128xf32>
    %113 = arith.addf %108, %112 : vector<8x128xf32>
    %114 = arith.index_cast %c6_i32 : i32 to index
    %c0_62 = arith.constant 0 : index
    %c0_63 = arith.constant 0 : index
    %115 = vector.load %arg10[%114, %c0_62, %c0_63] : memref<8x8x128xf32, #tpu.memory_space<vmem>>, vector<1x8x128xf32>
    %116 = vector.shape_cast %115 : vector<1x8x128xf32> to vector<8x128xf32>
    %117 = vector.shape_cast %113 : vector<8x128xf32> to vector<1x8x128xf32>
    tpu.vector_store %arg10[%114, %c0_62, %c0_63], %117 {strides = array<i32>} : memref<8x8x128xf32, #tpu.memory_space<vmem>>, vector<1x8x128xf32>,
    %c7_i32 = arith.constant 7 : i32
    %118 = arith.index_cast %c7_i32 : i32 to index
    %c0_64 = arith.constant 0 : index
    %c0_65 = arith.constant 0 : index
    %119 = vector.load %arg7[%118, %c0_64, %c0_65] : memref<8x8x128xf32, #tpu.memory_space<vmem>>, vector<1x8x128xf32>
    %120 = vector.shape_cast %119 : vector<1x8x128xf32> to vector<8x128xf32>
    %121 = arith.index_cast %c7_i32 : i32 to index
    %c0_66 = arith.constant 0 : index
    %c0_67 = arith.constant 0 : index
    %122 = vector.load %arg8[%121, %c0_66, %c0_67] : memref<8x8x128xf32, #tpu.memory_space<vmem>>, vector<1x8x128xf32>
    %123 = vector.shape_cast %122 : vector<1x8x128xf32> to vector<8x128xf32>
    %124 = arith.mulf %123, %113 : vector<8x128xf32>
    %125 = arith.addf %120, %124 : vector<8x128xf32>
    %126 = arith.index_cast %c7_i32 : i32 to index
    %c0_68 = arith.constant 0 : index
    %c0_69 = arith.constant 0 : index
    %127 = vector.load %arg10[%126, %c0_68, %c0_69] : memref<8x8x128xf32, #tpu.memory_space<vmem>>, vector<1x8x128xf32>
    %128 = vector.shape_cast %127 : vector<1x8x128xf32> to vector<8x128xf32>
    %129 = vector.shape_cast %125 : vector<8x128xf32> to vector<1x8x128xf32>
    tpu.vector_store %arg10[%126, %c0_68, %c0_69], %129 {strides = array<i32>} : memref<8x8x128xf32, #tpu.memory_space<vmem>>, vector<1x8x128xf32>,
    %c8_i32 = arith.constant 8 : i32
    %c0_70 = arith.constant 0 : index
    %c0_71 = arith.constant 0 : index
    %130 = vector.load %arg11[%c0_70, %c0_71] : memref<8x128xf32, #tpu.memory_space<vmem>>, vector<8x128xf32>
    tpu.vector_store %arg11[%c0_70, %c0_71], %125 {strides = array<i32>} : memref<8x128xf32, #tpu.memory_space<vmem>>, vector<8x128xf32>,
    %c0_72 = arith.constant 0 : index
    %c0_73 = arith.constant 0 : index
    %c0_74 = arith.constant 0 : index
    %131 = vector.load %arg9[%c0_72, %c0_73, %c0_74] : memref<8x8x128xf32, #tpu.memory_space<vmem>>, vector<8x8x128xf32>
    %c0_75 = arith.constant 0 : index
    %c0_76 = arith.constant 0 : index
    %c0_77 = arith.constant 0 : index
    %132 = vector.load %arg10[%c0_75, %c0_76, %c0_77] : memref<8x8x128xf32, #tpu.memory_space<vmem>>, vector<8x8x128xf32>
    %133 = arith.mulf %131, %132 : vector<8x8x128xf32>
    %c0_78 = arith.constant 0 : index
    %c0_79 = arith.constant 0 : index
    %c0_80 = arith.constant 0 : index
    %134 = vector.load %arg5[%c0_78, %c0_79, %c0_80] : memref<8x8x128xf32, #tpu.memory_space<vmem>>, vector<8x8x128xf32>
    tpu.vector_store %arg5[%c0_78, %c0_79, %c0_80], %133 {strides = array<i32>} : memref<8x8x128xf32, #tpu.memory_space<vmem>>, vector<8x8x128xf32>,
    %c0_81 = arith.constant 0 : index
    %c0_82 = arith.constant 0 : index
    %c0_83 = arith.constant 0 : index
    %135 = vector.load %arg6[%c0_81, %c0_82, %c0_83] : memref<1x8x128xf32, #tpu.memory_space<vmem>>, vector<1x8x128xf32>
    %136 = vector.shape_cast %135 : vector<1x8x128xf32> to vector<8x128xf32>
    %137 = vector.shape_cast %125 : vector<8x128xf32> to vector<1x8x128xf32>
    tpu.vector_store %arg6[%c0_81, %c0_82, %c0_83], %137 {strides = array<i32>} : memref<1x8x128xf32, #tpu.memory_space<vmem>>, vector<1x8x128xf32>,
    return
  }
  func.func @transform_0(%arg0: i32, %arg1: i32) -> (i32, i32, i32) {
    %c0_i32 = arith.constant 0 : i32
    %c0_i32_0 = arith.constant 0 : i32
    return %arg1, %arg0, %c0_i32 : i32, i32, i32
  }
  func.func @transform_1(%arg0: i32, %arg1: i32) -> (i32, i32) {
    %c0_i32 = arith.constant 0 : i32
    %c0_i32_0 = arith.constant 0 : i32
    %c0_i32_1 = arith.constant 0 : i32
    return %c0_i32, %c0_i32_0 : i32, i32
  }
  func.func @transform_2(%arg0: i32, %arg1: i32) -> (i32, i32) {
    %c0_i32 = arith.constant 0 : i32
    %c0_i32_0 = arith.constant 0 : i32
    %c0_i32_1 = arith.constant 0 : i32
    return %c0_i32, %c0_i32_0 : i32, i32
  }
  func.func @transform_3(%arg0: i32, %arg1: i32) -> (i32, i32, i32) {
    %c0_i32 = arith.constant 0 : i32
    %c0_i32_0 = arith.constant 0 : i32
    return %arg1, %arg0, %c0_i32 : i32, i32, i32
  }
  func.func @transform_4(%arg0: i32, %arg1: i32) -> (i32, i32, i32) {
    %c0_i32 = arith.constant 0 : i32
    %c0_i32_0 = arith.constant 0 : i32
    %c0_i32_1 = arith.constant 0 : i32
    return %c0_i32, %arg0, %c0_i32_0 : i32, i32, i32
  }
}

</mosaic_0001>

<bundles_post_ra>
// kernel: qrnn_forward.2
= control target key start
LH: loop header
LB: loop body
LE: loop exit
PB: predicated region body
PF: predicated region fallthrough
CT: control target
= control target key end

     0   :  { %s1419_s15 = smov 0   ;;  %s1421_s16 = smov 0   ;;  %s1669_s0 = inlined_call_operand.vmem [shape: bf16[16,16,128], index: 0, kind: input, shape index: {}]   ;;  %s1670_s1 = inlined_call_operand.vmem [shape: bf16[128,384], index: 1, kind: input, shape index: {}]   ;;  %s1671_s2 = inlined_call_operand.vmem [shape: f32[1,384], index: 2, kind: input, shape index: {}]   ;;  %s1672_s3 = inlined_call_operand.vmem [shape: f32[16,16,128], index: 3, kind: output, shape index: {0}]   ;;  %s1673_s4 = inlined_call_operand.vmem [shape: f32[1,16,128], index: 4, kind: output, shape index: {1}]  }
   0x1   :  { %s1423_s17 = smov 0   ;;  %s1425_s18 = smov 0  }
   0x2   :  { %s1427_s19 = smov 0   ;;  %s1429_s20 = smov 0  }
   0x3   :  { %s1431_s21 = smov 0  }
   0x4 LB: > { %s24_s22 = sadd.s32 1, %s1382_s19  ;;  %s27_s23 = sadd.s32 1, %s1386_s20  ;;  %s1390_s21 = sphi %s1431_s21, %s15_s21   ;;  %s1386_s20 = sphi %s1429_s20, %s1680_s20   ;;  %s1382_s19 = sphi %s1427_s19, %s1679_s19   ;;  %s1378_s18 = sphi %s1425_s18, %s1678_s18   ;;  %s1374_s17 = sphi %s1423_s17, %s1677_s17   ;;  %s1370_s16 = sphi %s1421_s16, %s1676_s16   ;;  %s1366_s15 = sphi %s1419_s15, %s1675_s15  }
   0x5   : > { %p25_p0 = scmp.ge.s32.totalorder %s24_s22, 2  ;;  %s1061_s24 = sadd.s32 4294967295, %s1390_s21  }
   0x6   : > { %p43_p1 = scmp.ne.s32.totalorder %s1370_s16, %s1366_s15  ;;  %p44_p2 = scmp.eq.s32.totalorder %s1390_s21, 0 }
   0x7   : > { %s1682_s22 = smov (%p25_p0, %s24_s22), 0  ;;  %s1684_s23 = smov (!%p25_p0, %s27_s23), %s1386_s20 }
   0x8   : > { %p29_p3 = scmp.ge.s32.totalorder %s1684_s23, 2  ;;  %p117_p4 = scmp.eq.s32.totalorder %s1061_s24, 3 }
   0x9   : > { %s31_s25 = ssub.s32 %s1382_s19, %s1682_s22  ;;  %p45_p5 = por %p44_p2, %p43_p1 }
   0xa   : > { %s1686_s23 = smov (%p29_p3, %s1684_s23), 0  ;;  %p1467_p6 = por %p117_p4, %p43_p1 }
   0xb   : > { %s32_s27 = ssub.s32 %s1386_s20, %s1686_s23  ;;  %s36_s29 = sadd.s32 1, %s1370_s16 }
   0xc   : > { %s33_s28 = sor.u32 %s32_s27, %s31_s25  ;;  %p1064_p8 = scmp.ge.s32.totalorder %s1390_s21, 4 }
   0xd   : > { %p34_p7 = scmp.eq.s32.totalorder %s33_s28, 0 }
   0xe   : > { %171 = sbr.rel (%p1064_p8) target bundleno = 32 (0x20), region = 24 }
   0xf   : > { %s1475_s30 = scalar_select %p34_p7, %s1370_s16, %s36_s29  }
  0x15   : > { %174 = sbr.rel (!%p45_p5) target bundleno = 32 (0x20), region = 28  ;;  %s176_s5 = sand.u32 (%p45_p5), 1, %s1370_s16  }
  0x16   : > { %s1124_s6 = sshll.u32 (%p45_p5), %s1382_s19, 4  ;;  %s1065_s7 = sshll.u32 (%p45_p5), %s176_s5, 5 }
  0x17   : > { %s181_s8 = sadd.s32 (%p45_p5), %s1386_s20, %s1124_s6  ;;  %s178_s13 = scalar_lea.vmem (%p45_p5), [#allocation7], %s1065_s7 }
  0x18   : > { %s1068_s9 = sshll.u32 (%p45_p5), %s181_s8, 2 }
  0x19   : > { %s183_s12 = scalar_lea.vmem (%p45_p5), %s1669_s0, %s1068_s9 }
  0x1a   : > { %v199_v0 = vld [vmem:[%s183_s12] sm:$0xf] (%p45_p5)  ;;  %v201_v1 = vld [vmem:[%s183_s12 + $0x8] sm:$0xf] (%p45_p5)  ;;  %v203_v2 = vld [vmem:[%s183_s12 + $0x10] sm:$0xf] (%p45_p5) }
  0x1b   : > { %200 = vst [vmem:[%s178_s13] sm:$0xf] (%p45_p5), %v199_v0  ;;  %202 = vst [vmem:[%s178_s13 + $0x4] sm:$0xf] (%p45_p5), %v201_v1  ;;  %v205_v3 = vld [vmem:[%s183_s12 + $0x18] sm:$0xf] (%p45_p5) }
  0x1c   : > { %204 = vst [vmem:[%s178_s13 + $0x8] sm:$0xf] %v203_v2  ;;  %v207_v4 = vld [vmem:[%s183_s12 + $0x20] sm:$0xf]  ;;  %v209_v5 = vld [vmem:[%s183_s12 + $0x28] sm:$0xf] }
  0x1d   : > { %206 = vst [vmem:[%s178_s13 + $0xc] sm:$0xf] %v205_v3  ;;  %208 = vst [vmem:[%s178_s13 + $0x10] sm:$0xf] %v207_v4  ;;  %v211_v6 = vld [vmem:[%s183_s12 + $0x30] sm:$0xf] }
  0x1e   : > { %210 = vst [vmem:[%s178_s13 + $0x14] sm:$0xf] %v209_v5  ;;  %v213_v7 = vld [vmem:[%s183_s12 + $0x38] sm:$0xf]  ;;  %212 = vst [vmem:[%s178_s13 + $0x18] sm:$0xf] %v211_v6 }
  0x1f   : > { %214 = vst [vmem:[%s178_s13 + $0x1c] sm:$0xf] %v213_v7 }
  0x20 PF: > { %p1069_p9 = scmp.ge.s32.totalorder %s1390_s21, 1  ;;  %p252_p10 = scmp.lt.s32.totalorder %s1390_s21, 5 }
  0x22   : > { %p253_p11 = pnand %p1069_p9, %p252_p10 }
  0x23   : > { %p289_p12 = scmp.lt.s32.totalorder (!%p253_p11), %s1378_s18, 1  ;;  %v1220_v8 = vld [vmem:[%s1670_s1 + $0x4] ss:$12 sps:$4 sm:$0xff] (!%p253_p11)   ;;  %v1222_v9 = vld [vmem:[%s1670_s1] ss:$12 sps:$4 sm:$0xff] (!%p253_p11)   ;;  %v1392_v10 = vmov (!%p253_p11), 0   ;;  %v336_v37 = vlaneseq (!%p253_p11) }
  0x24   : > { %256 = sbr.rel (%p253_p11) target bundleno = 393 (0x189), region = 69  ;;  %535 = vmatprep.mubr.bf16.mxu0 (!%p253_p11), %v1392_v10  ;;  %503 = vmatprep.subr.bf16.mxu0 (!%p253_p11), %v1220_v8  ;;  %v1223_v11 = vld [vmem:[%s1670_s1 + $0x1c] ss:$12 sps:$4 sm:$0xff] (!%p253_p11)   ;;  %v1225_v12 = vld [vmem:[%s1670_s1 + $0x18] ss:$12 sps:$4 sm:$0xff] (!%p253_p11)   ;;  %s259_s14 = sand.u32 (!%p253_p11), 1, %s1366_s15  }
  0x25   : > { %504 = vmatpush1.bf16.msra.mxu0 (!%p253_p11), %v1222_v9  ;;  %v1226_v13 = vld [vmem:[%s1670_s1 + $0x34] ss:$12 sps:$4 sm:$0xff] (!%p253_p11)   ;;  %s1513_s27 = sshll.u32 (!%p253_p11), %s259_s14, 6  ;;  %v1228_v15 = vld [vmem:[%s1670_s1 + $0x30] ss:$12 sps:$4 sm:$0xff] (!%p253_p11)   ;;  %s1070_s15 = sshll.u32 (!%p253_p11), %s259_s14, 5 }
  0x26   : > { %505 = vmatprep.subr.bf16.mxu0 (!%p253_p11), %v1223_v11  ;;  %v1232_v14 = vld [vmem:[%s1670_s1 + $0x8] ss:$12 sps:$4 sm:$0xff] (!%p253_p11)   ;;  %v1229_v16 = vld [vmem:[%s1670_s1 + $0x4c] ss:$12 sps:$4 sm:$0xff] (!%p253_p11)   ;;  %v1233_v20 = vld [vmem:[%s1670_s1 + $0x64] ss:$12 sps:$4 sm:$0xff] (!%p253_p11)  }
  0x27   : > { %1138 = vmatprep.subr.bf16.mxu1 (!%p253_p11), %v1232_v14  ;;  %v1236_v17 = vld [vmem:[%s1670_s1 + $0x20] ss:$12 sps:$4 sm:$0xff] (!%p253_p11)   ;;  %v1240_v18 = vld [vmem:[%s1670_s1 + $0x38] ss:$12 sps:$4 sm:$0xff] (!%p253_p11)   ;;  %v1231_v19 = vld [vmem:[%s1670_s1 + $0x48] ss:$12 sps:$4 sm:$0xff] (!%p253_p11)  }
  0x28   : > { %1139 = vmatpush3.bf16.msra.mxu1 (!%p253_p11), %v1232_v14  ;;  %v1235_v21 = vld [vmem:[%s1670_s1 + $0x60] ss:$12 sps:$4 sm:$0xff] (!%p253_p11)   ;;  %v1244_v22 = vld [vmem:[%s1670_s1 + $0x50] ss:$12 sps:$4 sm:$0xff] (!%p253_p11)   ;;  %v1248_v25 = vld [vmem:[%s1670_s1 + $0x68] ss:$12 sps:$4 sm:$0xff] (!%p253_p11)  }
  0x29   : > { %506 = vmatpush1.bf16.msra.mxu0 (!%p253_p11), %v1225_v12  ;;  %1140 = vmatprep.subr.bf16.mxu1 (!%p253_p11), %v1236_v17  ;;  %v1237_v23 = vld [vmem:[%s1670_s1 + $0x7c] ss:$12 sps:$4 sm:$0xff] (!%p253_p11)   ;;  %v1239_v26 = vld [vmem:[%s1670_s1 + $0x78] ss:$12 sps:$4 sm:$0xff] (!%p253_p11)   ;;  %v1241_v27 = vld [vmem:[%s1670_s1 + $0x94] ss:$12 sps:$4 sm:$0xff] (!%p253_p11)  }
  0x2a   : > { %507 = vmatprep.subr.bf16.mxu0 (!%p253_p11), %v1226_v13  ;;  %v1250_v28 = vld [vmem:[%s1670_s1 + $0x80] ss:$12 sps:$4 sm:$0xff] (!%p253_p11)   ;;  %v1243_v29 = vld [vmem:[%s1670_s1 + $0x90] ss:$12 sps:$4 sm:$0xff] (!%p253_p11)   ;;  %v1251_v31 = vld [vmem:[%s1670_s1 + $0x98] ss:$12 sps:$4 sm:$0xff] (!%p253_p11)  }
  0x2b   : > { %s290_s28 = scalar_select %p289_p12, %s1378_s18, 1  ;;  %v1245_v30 = vld [vmem:[%s1670_s1 + $0xac] ss:$12 sps:$4 sm:$0xff]   ;;  %v1247_v32 = vld [vmem:[%s1670_s1 + $0xa8] ss:$12 sps:$4 sm:$0xff]   ;;  %v337_v38 = vshrl.u32 %v336_v37, 7 }
  0x2c   : > { %1141 = vmatpush3.bf16.msra.mxu1 %v1236_v17  ;;  %v1253_v33 = vld [vmem:[%s1670_s1 + $0xb0] ss:$12 sps:$4 sm:$0xff]   ;;  %v334_v40 = vld [vmem:[%s1671_s2] sm:$0x7]  ;;  %p1117_p13 = scmp.ne.s32.totalorder %s1374_s17, 0 }
  0x2d   : > { %s1072_s8 = sshll.u32 %s290_s28, 3  ;;  %508 = vmatpush1.bf16.msra.mxu0 %v1228_v15  ;;  %1142 = vmatprep.subr.bf16.mxu1 %v1240_v18  ;;  %v342_v39 = vsub.s32 1, %v337_v38  ;;  %v338_v41 = vsub.s32 0, %v337_v38  ;;  %v346_v43 = vsub.s32 2, %v337_v38 }
  0x2e   : > { %s1507_s13 = scalar_lea.vmem %s1673_s4, %s1072_s8  ;;  %509 = vmatprep.subr.bf16.mxu0 %v1229_v16  ;;  %s1542_s8 = scalar_lea.vmem [#allocation7], %s1070_s15 }
  0x2f   : > { %v1249_v24 = vld [vmem:[%s1542_s8] sm:$0xff]   ;;  %v1252_v34 = vld [vmem:[%s1542_s8 + $0x8] sm:$0xff]   ;;  %v1254_v35 = vld [vmem:[%s1542_s8 + $0x10] sm:$0xff]   ;;  %v1581_v42 = vrot.slane %v334_v40, %v342_v39  ;;  %v1583_v46 = vrot.slane %v334_v40, %v338_v41  ;;  %v1586_v50 = vrot.slane %v334_v40, %v346_v43 }
  0x30   : > { %1143 = vmatpush3.bf16.msra.mxu1 %v1240_v18  ;;  %1154 = vmatprep.mubr.bf16.mxu1 %v1249_v24  ;;  %v1255_v36 = vld [vmem:[%s1542_s8 + $0x18] sm:$0xff]   ;;  %s1621_s8 = scalar_lea.vmem [#allocation8], %s1513_s27 }
  0x31   : > { %510 = vmatpush1.bf16.msra.mxu0 %v1231_v19  ;;  %1144 = vmatprep.subr.bf16.mxu1 %v1244_v22 }
  0x32   : > { %511 = vmatprep.subr.bf16.mxu0 %v1233_v20 }
  0x34   : > { %1145 = vmatpush3.bf16.msra.mxu1 %v1244_v22 }
  0x35   : > { %512 = vmatpush1.bf16.msra.mxu0 %v1235_v21  ;;  %1146 = vmatprep.subr.bf16.mxu1 %v1248_v25 }
  0x36   : > { %513 = vmatprep.subr.bf16.mxu0 %v1237_v23 }
  0x38   : > { %1147 = vmatpush3.bf16.msra.mxu1 %v1248_v25 }
  0x39   : > { %514 = vmatpush1.bf16.msra.mxu0 %v1239_v26  ;;  %1148 = vmatprep.subr.bf16.mxu1 %v1250_v28 }
  0x3a   : > { %515 = vmatprep.subr.bf16.mxu0 %v1241_v27 }
  0x3c   : > { %1149 = vmatpush3.bf16.msra.mxu1 %v1250_v28 }
  0x3d   : > { %516 = vmatpush1.bf16.msra.mxu0 %v1243_v29  ;;  %1150 = vmatprep.subr.bf16.mxu1 %v1251_v31 }
  0x3e   : > { %517 = vmatprep.subr.bf16.mxu0 %v1245_v30 }
  0x40   : > { %1151 = vmatpush3.bf16.msra.mxu1 %v1251_v31 }
  0x41   : > { %518 = vmatpush1.bf16.msra.mxu0 %v1247_v32  ;;  %1152 = vmatprep.subr.bf16.mxu1 %v1253_v33 }
  0x44   : > { %536 = vmatmul.mubr.bf16.vlgmr.msra.gmra.mrb[0].mxu0 %v1249_v24  ;;  %1153 = vmatpush3.bf16.msra.mxu1 %v1253_v33 }
  0x45   : > { %545 = vmatprep.mubr.bf16.mxu0 %v1392_v10 }
  0x47   : > { %1155 = vmatmul.mubr.bf16.vlgmr.msra.gmra.mrb[0].mxu1 %v1252_v34 }
  0x48   : > { %1158 = vmatprep.mubr.bf16.mxu1 %v1254_v35 }
  0x4c   : > { %546 = vmatmul.mubr.bf16.gmra.mrb[4].mxu0 %v1252_v34 }
  0x4d   : > { %555 = vmatprep.mubr.bf16.mxu0 %v1392_v10 }
  0x4f   : > { %1159 = vmatmul.mubr.bf16.gmra.mrb[4].mxu1 %v1255_v36 }
  0x54   : > { %556 = vmatmul.mubr.bf16.gmra.mrb[8].mxu0 %v1254_v35 }
  0x55   : > { %565 = vmatprep.mubr.bf16.mxu0 %v1392_v10 }
  0x5c   : > { %566 = vmatmul.mubr.bf16.gmra.mrb[12].mxu0 %v1255_v36 }
 0x117   : > { %v537_v44 = vpop.f32.mrb[0].mxu0 }
 0x118   : > { %v539_v45 = vpop.f32.mrb[1].mxu0  ;;  %v538_v53 = vadd.f32 %v537_v44, %v1583_v46 }
 0x119   : > { %v540_v47 = vadd.f32 %v539_v45, %v1581_v42  ;;  %v541_v48 = vpop.f32.mrb[2].mxu0 }
 0x11a   : > { %v543_v49 = vpop.f32.mrb[3].mxu0  ;;  %v1156_v55 = vpop.f32.mrb[0].mxu1  ;;  %v542_v56 = vadd.f32 %v541_v48, %v1583_v46 }
 0x11b   : > { %v1101_v51 = vmul.f32 -1.442695, %v540_v47  ;;  %v544_v52 = vadd.f32 %v543_v49, %v1581_v42  ;;  %v619_v57 = vadd.f32 %v1156_v55, %v1586_v50  ;;  %v610_v58 = vpop.f32.mrb[1].mxu1 }
 0x11c   : > { %v611_v60 = vadd.f32 %v610_v58, %v1586_v50  ;;  %v1157_v61 = vpop.f32.mrb[2].mxu1 }
 0x11d   : > { %1256 = vpow2.f32 %v1101_v51  ;;  %v1102_v54 = vmul.f32 -1.442695, %v544_v52  ;;  %v1111_v0 = vmul.f32 -1.442695, %v619_v57  ;;  %v622_v1 = vadd.f32 %v1157_v61, %v1586_v50  ;;  %v613_v2 = vpop.f32.mrb[3].mxu1 }
 0x11e   : > { %v614_v5 = vadd.f32 %v613_v2, %v1586_v50  ;;  %v1109_v7 = vmul.f32 -1.442695, %v611_v60 }
 0x11f   : > { %1258 = vpow2.f32 %v1102_v54  ;;  %v547_v59 = vpop.f32.mrb[4].mxu0  ;;  %v1112_v10 = vmul.f32 -1.442695, %v622_v1 }
 0x120   : > { %v548_v62 = vadd.f32 %v547_v59, %v1583_v46  ;;  %v549_v63 = vpop.f32.mrb[5].mxu0  ;;  %1260 = vtanh.f32 %v538_v53  ;;  %v1110_v12 = vmul.f32 -1.442695, %v614_v5 }
 0x121   : > { %v550_v3 = vadd.f32 %v549_v63, %v1581_v42  ;;  %v551_v4 = vpop.f32.mrb[6].mxu0  ;;  %1262 = vtanh.f32 %v542_v56 }
 0x122   : > { %v553_v6 = vpop.f32.mrb[7].mxu0  ;;  %1264 = vpow2.f32 %v1111_v0  ;;  %v1160_v13 = vpop.f32.mrb[4].mxu1  ;;  %v552_v16 = vadd.f32 %v551_v4, %v1583_v46 }
 0x123   : > { %v1103_v8 = vmul.f32 -1.442695, %v550_v3  ;;  %v554_v9 = vadd.f32 %v553_v6, %v1581_v42  ;;  %1266 = vtanh.f32 %v548_v62  ;;  %v626_v14 = vpop.f32.mrb[5].mxu1  ;;  %v635_v25 = vadd.f32 %v1160_v13, %v1586_v50 }
 0x124   : > { %v1161_v18 = vpop.f32.mrb[6].mxu1  ;;  %v627_v43 = vadd.f32 %v626_v14, %v1586_v50 }
 0x125   : > { %1268 = vpow2.f32 %v1103_v8  ;;  %v1104_v11 = vmul.f32 -1.442695, %v554_v9  ;;  %v629_v21 = vpop.f32.mrb[7].mxu1  ;;  %v1115_v35 = vmul.f32 -1.442695, %v635_v25  ;;  %v638_v57 = vadd.f32 %v1161_v18, %v1586_v50 }
 0x126   : > { %1270 = vpow2.f32 %v1109_v7  ;;  %v1113_v60 = vmul.f32 -1.442695, %v627_v43  ;;  %v630_v2 = vadd.f32 %v629_v21, %v1586_v50 }
 0x127   : > { %v1257_v15 = vpop.eup %1256  ;;  %1272 = vpow2.f32 %v1104_v11  ;;  %v557_v17 = vpop.f32.mrb[8].mxu0  ;;  %v1116_v6 = vmul.f32 -1.442695, %v638_v57  ;;  %v1393_v57 = vmov (!%p1117_p13), 0.0  }
 0x128   : > { %v673_v19 = vadd.f32 1.0, %v1257_v15  ;;  %v559_v20 = vpop.f32.mrb[9].mxu0  ;;  %1274 = vpow2.f32 %v1112_v10  ;;  %v558_v27 = vadd.f32 %v557_v17, %v1583_v46  ;;  %v1114_v13 = vmul.f32 -1.442695, %v630_v2  ;;  %789 = vst [vmem:[#allocation6] sm:$0xff] (!%p1117_p13), %v1393_v57 }
 0x129   : > { %v1259_v22 = vpop.eup %1258  ;;  %v560_v23 = vadd.f32 %v559_v20, %v1581_v42  ;;  %v561_v24 = vpop.f32.mrb[10].mxu0  ;;  %1276 = vpow2.f32 %v1110_v12 }
 0x12a   : > { %1278 = vrcp.f32 %v673_v19  ;;  %v674_v26 = vadd.f32 1.0, %v1259_v22  ;;  %v563_v28 = vpop.f32.mrb[11].mxu0  ;;  %v1261_v29 = vpop.eup %1260  ;;  %v562_v56 = vadd.f32 %v561_v24, %v1583_v46 }
 0x12b   : > { %1280 = vtanh.f32 %v552_v16  ;;  %v1105_v30 = vmul.f32 -1.442695, %v560_v23  ;;  %v564_v31 = vadd.f32 %v563_v28, %v1581_v42  ;;  %v1263_v32 = vpop.eup %1262 }
 0x12c   : > { %1282 = vrcp.f32 %v674_v26  ;;  %v1265_v33 = vpop.eup %1264 }
 0x12d   : > { %1284 = vpow2.f32 %v1105_v30  ;;  %v1106_v34 = vmul.f32 -1.442695, %v564_v31  ;;  %v1603_v36 = vpop.eup %1266  ;;  %v723_v37 = vadd.f32 1.0, %v1265_v33 }
 0x12e   : > { %1286 = vtanh.f32 %v558_v27 }
 0x12f   : > { %v1269_v38 = vpop.eup %1268  ;;  %1288 = vpow2.f32 %v1106_v34  ;;  %v1605_v39 = vpop.f32.mrb[12].mxu0 }
 0x130   : > { %v1271_v40 = vpop.eup %1270  ;;  %v675_v41 = vadd.f32 1.0, %v1269_v38  ;;  %1290 = vrcp.f32 %v723_v37  ;;  %v569_v44 = vpop.f32.mrb[13].mxu0  ;;  %v568_v24 = vadd.f32 %v1605_v39, %v1583_v46 }
 0x131   : > { %v1273_v45 = vpop.eup %1272  ;;  %v721_v47 = vadd.f32 1.0, %v1271_v40  ;;  %1292 = vpow2.f32 %v1115_v35  ;;  %v570_v48 = vadd.f32 %v569_v44, %v1581_v42  ;;  %v1609_v49 = vpop.f32.mrb[14].mxu0 }
 0x132   : > { %v1275_v51 = vpop.eup %1274  ;;  %1294 = vrcp.f32 %v675_v41  ;;  %v676_v52 = vadd.f32 1.0, %v1273_v45  ;;  %v573_v53 = vpop.f32.mrb[15].mxu0  ;;  %v572_v38 = vadd.f32 %v1609_v49, %v1583_v46 }
 0x133   : > { %v1277_v54 = vpop.eup %1276  ;;  %1296 = vrcp.f32 %v721_v47  ;;  %v724_v55 = vadd.f32 1.0, %v1275_v51  ;;  %v1107_v0 = vmul.f32 -1.442695, %v570_v48  ;;  %v574_v9 = vadd.f32 %v573_v53, %v1581_v42 }
 0x134   : > { %v1279_v58 = vpop.eup %1278  ;;  %1298 = vrcp.f32 %v676_v52  ;;  %v722_v59 = vadd.f32 1.0, %v1277_v54 }
 0x135   : > { %v1281_v61 = vpop.eup %1280  ;;  %v745_v62 = vmul.f32 %v1279_v58, %v1261_v29  ;;  %v761_v63 = vsub.f32 1.0, %v1279_v58  ;;  %1300 = vrcp.f32 %v724_v55  ;;  %v1108_v16 = vmul.f32 -1.442695, %v574_v9 }
 0x136   : > { %v1283_v1 = vpop.eup %1282  ;;  %1302 = vrcp.f32 %v722_v59 }
 0x137   : > { %v1285_v3 = vpop.eup %1284  ;;  %753 = vst [vmem:[#allocation2] sm:$0xff] %v745_v62  ;;  %769 = vst [vmem:[#allocation3] sm:$0xff] %v761_v63  ;;  %v746_v4 = vmul.f32 %v1283_v1, %v1263_v32  ;;  %v762_v5 = vsub.f32 1.0, %v1283_v1  ;;  %1304 = vtanh.f32 %v562_v56 }
 0x138   : > { %v1287_v7 = vpop.eup %1286  ;;  %v677_v8 = vadd.f32 1.0, %v1285_v3  ;;  %1306 = vpow2.f32 %v1113_v60 }
 0x139   : > { %v1289_v10 = vpop.eup %1288  ;;  %754 = vst [vmem:[#allocation2 + $0x8] sm:$0xff] %v746_v4  ;;  %770 = vst [vmem:[#allocation3 + $0x8] sm:$0xff] %v762_v5  ;;  %1308 = vpow2.f32 %v1107_v0 }
 0x13a   : > { %v1291_v11 = vpop.eup %1290  ;;  %1310 = vrcp.f32 %v677_v8  ;;  %v678_v12 = vadd.f32 1.0, %v1289_v10 }
 0x13b   : > { %v1293_v50 = vpop.eup %1292  ;;  %779 = vst [vmem:[#allocation4 + $0x10] sm:$0xff] %v1291_v11  ;;  %1312 = vpow2.f32 %v1116_v6 }
 0x13c   : > { %v1295_v14 = vpop.eup %1294  ;;  %1314 = vrcp.f32 %v678_v12  ;;  %v727_v15 = vadd.f32 1.0, %v1293_v50 }
 0x13d   : > { %v1297_v17 = vpop.eup %1296  ;;  %v747_v18 = vmul.f32 %v1295_v14, %v1603_v36  ;;  %v763_v19 = vsub.f32 1.0, %v1295_v14 }
 0x13e   : > { %v1299_v42 = vpop.eup %1298  ;;  %777 = vst [vmem:[#allocation4] sm:$0xff] %v1297_v17  ;;  %1316 = vrcp.f32 %v727_v15 }
 0x13f   : > { %v1301_v20 = vpop.eup %1300  ;;  %755 = vst [vmem:[#allocation2 + $0x10] sm:$0xff] %v747_v18  ;;  %771 = vst [vmem:[#allocation3 + $0x10] sm:$0xff] %v763_v19  ;;  %v748_v21 = vmul.f32 %v1299_v42, %v1281_v61  ;;  %v764_v22 = vsub.f32 1.0, %v1299_v42  ;;  %1318 = vpow2.f32 %v1114_v13 }
 0x140   : > { %v1303_v23 = vpop.eup %1302  ;;  %780 = vst [vmem:[#allocation4 + $0x18] sm:$0xff] %v1301_v20  ;;  %1320 = vpow2.f32 %v1108_v16 }
 0x141   : > { %v1305_v25 = vpop.eup %1304  ;;  %756 = vst [vmem:[#allocation2 + $0x18] sm:$0xff] %v748_v21  ;;  %772 = vst [vmem:[#allocation3 + $0x18] sm:$0xff] %v764_v22  ;;  %1322 = vtanh.f32 %v568_v24 }
 0x142   : > { %778 = vst [vmem:[#allocation4 + $0x8] sm:$0xff] %v1303_v23  ;;  %v1307_v26 = vpop.eup %1306 }
 0x143   : > { %v1309_v27 = vpop.eup %1308  ;;  %v725_v28 = vadd.f32 1.0, %v1307_v26 }
 0x144   : > { %v1311_v29 = vpop.eup %1310  ;;  %v679_v30 = vadd.f32 1.0, %v1309_v27 }
 0x145   : > { %v1313_v31 = vpop.eup %1312  ;;  %v749_v32 = vmul.f32 %v1311_v29, %v1287_v7  ;;  %v765_v33 = vsub.f32 1.0, %v1311_v29  ;;  %1324 = vrcp.f32 %v725_v28 }
 0x146   : > { %v1315_v34 = vpop.eup %1314  ;;  %1326 = vrcp.f32 %v679_v30  ;;  %v728_v35 = vadd.f32 1.0, %v1313_v31 }
 0x147   : > { %757 = vst [vmem:[#allocation2 + $0x20] sm:$0xff] %v749_v32  ;;  %773 = vst [vmem:[#allocation3 + $0x20] sm:$0xff] %v765_v33  ;;  %v750_v36 = vmul.f32 %v1315_v34, %v1305_v25  ;;  %v766_v37 = vsub.f32 1.0, %v1315_v34 }
 0x148   : > { %v1317_v39 = vpop.eup %1316  ;;  %1328 = vrcp.f32 %v728_v35 }
 0x149   : > { %v1319_v40 = vpop.eup %1318  ;;  %758 = vst [vmem:[#allocation2 + $0x28] sm:$0xff] %v750_v36  ;;  %774 = vst [vmem:[#allocation3 + $0x28] sm:$0xff] %v766_v37  ;;  %1330 = vtanh.f32 %v572_v38 }
 0x14a   : > { %783 = vst [vmem:[#allocation4 + $0x30] sm:$0xff] %v1317_v39  ;;  %v1321_v41 = vpop.eup %1320  ;;  %v726_v43 = vadd.f32 1.0, %v1319_v40 }
 0x14b   : > { %v680_v44 = vadd.f32 1.0, %v1321_v41  ;;  %v1323_v45 = vpop.eup %1322 }
 0x14c   : > { %1332 = vrcp.f32 %v726_v43 }
 0x14d   : > { %1334 = vrcp.f32 %v680_v44 }
 0x14f   : > { %v1325_v47 = vpop.eup %1324 }
 0x150   : > { %v1327_v48 = vpop.eup %1326  ;;  %781 = vst [vmem:[#allocation4 + $0x20] sm:$0xff] %v1325_v47 }
 0x151   : > { %v751_v51 = vmul.f32 %v1327_v48, %v1323_v45  ;;  %v767_v52 = vsub.f32 1.0, %v1327_v48 }
 0x152   : > { %v1329_v46 = vpop.eup %1328 }
 0x153   : > { %759 = vst [vmem:[#allocation2 + $0x30] sm:$0xff] %v751_v51  ;;  %775 = vst [vmem:[#allocation3 + $0x30] sm:$0xff] %v767_v52  ;;  %v1331_v49 = vpop.eup %1330 }
 0x154   : > { %784 = vst [vmem:[#allocation4 + $0x38] sm:$0xff] %v1329_v46  ;;  %788 = sbr.rel (%p1117_p13) target bundleno = 347 (0x15b), region = 77 }
 0x156   : > { %v1333_v53 = vpop.eup %1332 }
 0x157   : > { %v1335_v54 = vpop.eup %1334  ;;  %782 = vst [vmem:[#allocation4 + $0x28] sm:$0xff] %v1333_v53 }
 0x158   : > { %v752_v55 = vmul.f32 %v1335_v54, %v1331_v49  ;;  %v768_v56 = vsub.f32 1.0, %v1335_v54 }
 0x15a   : > { %760 = vst [vmem:[#allocation2 + $0x38] sm:$0xff] %v752_v55  ;;  %776 = vst [vmem:[#allocation3 + $0x38] sm:$0xff] %v768_v56 }
 0x15b PF: > { %v790_v58 = vld [vmem:[#allocation6] sm:$0xff]  ;;  %v799_v62 = vld [vmem:[#allocation3 + $0x8] sm:$0xff]  ;;  %v807_v3 = vld [vmem:[#allocation3 + $0x10] sm:$0xff]  ;;  %s1125_s27 = sshll.u32 (%p1467_p6), %s1374_s17, 4 }
 0x15c   : > { %v791_v59 = vld [vmem:[#allocation2] sm:$0xff]  ;;  %v797_v0 = vld [vmem:[#allocation2 + $0x8] sm:$0xff]  ;;  %v805_v7 = vld [vmem:[#allocation2 + $0x10] sm:$0xff] }
 0x15d   : > { %v792_v60 = vld [vmem:[#allocation3] sm:$0xff]  ;;  %v854_v5 = vld [vmem:[#allocation4 + $0x8] sm:$0xff]  ;;  %v815_v10 = vld [vmem:[#allocation3 + $0x18] sm:$0xff] }
 0x15e   : > { %v793_v61 = vmul.f32 %v792_v60, %v790_v58  ;;  %v853_v2 = vld [vmem:[#allocation4] sm:$0xff]  ;;  %v855_v11 = vld [vmem:[#allocation4 + $0x10] sm:$0xff]  ;;  %v813_v50 = vld [vmem:[#allocation2 + $0x18] sm:$0xff] }
 0x15f   : > { %v823_v15 = vld [vmem:[#allocation3 + $0x20] sm:$0xff]  ;;  %v856_v16 = vld [vmem:[#allocation4 + $0x18] sm:$0xff]  ;;  %v831_v20 = vld [vmem:[#allocation3 + $0x28] sm:$0xff] }
 0x160   : > { %v794_v63 = vadd.f32 %v793_v61, %v791_v59  ;;  %v821_v18 = vld [vmem:[#allocation2 + $0x20] sm:$0xff]  ;;  %v829_v23 = vld [vmem:[#allocation2 + $0x28] sm:$0xff]  ;;  %v839_v26 = vld [vmem:[#allocation3 + $0x30] sm:$0xff] }
 0x161   : > { %v857_v21 = vld [vmem:[#allocation4 + $0x20] sm:$0xff]  ;;  %v858_v27 = vld [vmem:[#allocation4 + $0x28] sm:$0xff]  ;;  %v837_v29 = vld [vmem:[#allocation2 + $0x30] sm:$0xff] }
 0x162   : > { %v800_v1 = vmul.f32 %v799_v62, %v794_v63  ;;  %v869_v4 = vmul.f32 %v853_v2, %v794_v63  ;;  %v847_v32 = vld [vmem:[#allocation3 + $0x38] sm:$0xff]  ;;  %v859_v33 = vld [vmem:[#allocation4 + $0x30] sm:$0xff] }
 0x163   : > { %v845_v35 = vld [vmem:[#allocation2 + $0x38] sm:$0xff] }
 0x164   : > { %v801_v6 = vadd.f32 %v800_v1, %v797_v0  ;;  %877 = vst [vmem:[%s1621_s8] sm:$0xff] %v869_v4  ;;  %v860_v38 = vld [vmem:[#allocation4 + $0x38] sm:$0xff] }
 0x166   : > { %v808_v8 = vmul.f32 %v807_v3, %v801_v6  ;;  %v870_v9 = vmul.f32 %v854_v5, %v801_v6 }
 0x168   : > { %v809_v12 = vadd.f32 %v808_v8, %v805_v7  ;;  %878 = vst [vmem:[%s1621_s8 + $0x8] sm:$0xff] %v870_v9 }
 0x16a   : > { %v816_v13 = vmul.f32 %v815_v10, %v809_v12  ;;  %v871_v14 = vmul.f32 %v855_v11, %v809_v12 }
 0x16b   : > { %v943_v41 = vld [vmem:[%s1621_s8] sm:$0xff] (%p1467_p6) }
 0x16c   : > { %v817_v17 = vadd.f32 %v816_v13, %v813_v50  ;;  %879 = vst [vmem:[%s1621_s8 + $0x10] sm:$0xff] %v871_v14 }
 0x16e   : > { %v824_v19 = vmul.f32 %v823_v15, %v817_v17  ;;  %v872_v42 = vmul.f32 %v856_v16, %v817_v17 }
 0x16f   : > { %v945_v43 = vld [vmem:[%s1621_s8 + $0x8] sm:$0xff] (%p1467_p6) }
 0x170   : > { %v825_v22 = vadd.f32 %v824_v19, %v821_v18  ;;  %880 = vst [vmem:[%s1621_s8 + $0x18] sm:$0xff] %v872_v42 }
 0x172   : > { %v832_v24 = vmul.f32 %v831_v20, %v825_v22  ;;  %v873_v25 = vmul.f32 %v857_v21, %v825_v22 }
 0x173   : > { %v947_v44 = vld [vmem:[%s1621_s8 + $0x10] sm:$0xff] (%p1467_p6) }
 0x174   : > { %v833_v28 = vadd.f32 %v832_v24, %v829_v23  ;;  %881 = vst [vmem:[%s1621_s8 + $0x20] sm:$0xff] %v873_v25 }
 0x176   : > { %v840_v30 = vmul.f32 %v839_v26, %v833_v28  ;;  %v874_v31 = vmul.f32 %v858_v27, %v833_v28 }
 0x177   : > { %v949_v45 = vld [vmem:[%s1621_s8 + $0x18] sm:$0xff] (%p1467_p6) }
 0x178   : > { %v841_v34 = vadd.f32 %v840_v30, %v837_v29  ;;  %882 = vst [vmem:[%s1621_s8 + $0x28] sm:$0xff] %v874_v31 }
 0x17a   : > { %v848_v36 = vmul.f32 %v847_v32, %v841_v34  ;;  %v875_v37 = vmul.f32 %v859_v33, %v841_v34  ;;  %896 = sbr.rel (!%p1467_p6) target bundleno = 393 (0x189), region = 81 }
 0x17b   : > { %v951_v47 = vld [vmem:[%s1621_s8 + $0x20] sm:$0xff] (%p1467_p6) }
 0x17c   : > { %v849_v39 = vadd.f32 %v848_v36, %v845_v35  ;;  %883 = vst [vmem:[%s1621_s8 + $0x30] sm:$0xff] %v875_v37 }
 0x17e   : > { %852 = vst [vmem:[#allocation6] sm:$0xff] %v849_v39  ;;  %885 = vst [vmem:[%s1507_s13] sm:$0xff] %v849_v39  ;;  %v876_v40 = vmul.f32 %v860_v38, %v849_v39  ;;  %s899_s13 = sadd.s32 (%p1467_p6), %s1378_s18, %s1125_s27 }
 0x17f   : > { %v953_v48 = vld [vmem:[%s1621_s8 + $0x28] sm:$0xff] (%p1467_p6)  ;;  %s1121_s26 = sshll.u32 (%p1467_p6), %s899_s13, 3 }
 0x180   : > { %884 = vst [vmem:[%s1621_s8 + $0x38] sm:$0xff] %v876_v40  ;;  %s901_s14 = scalar_lea.vmem (%p1467_p6), %s1672_s3, %s1121_s26 }
 0x181   : > { %944 = vst [vmem:[%s901_s14] sm:$0xff] %v943_v41  ;;  %946 = vst [vmem:[%s901_s14 + $0x10] sm:$0xff] %v945_v43 }
 0x182   : > { %948 = vst [vmem:[%s901_s14 + $0x20] sm:$0xff] %v947_v44  ;;  %950 = vst [vmem:[%s901_s14 + $0x30] sm:$0xff] %v949_v45 }
 0x183   : > { %v955_v51 = vld [vmem:[%s1621_s8 + $0x30] sm:$0xff]  ;;  %952 = vst [vmem:[%s901_s14 + $0x40] sm:$0xff] %v951_v47  ;;  %954 = vst [vmem:[%s901_s14 + $0x50] sm:$0xff] %v953_v48 }
 0x184   : > { %956 = vst [vmem:[%s901_s14 + $0x60] sm:$0xff] %v955_v51 }
 0x187   : > { %v957_v52 = vld [vmem:[%s1621_s8 + $0x38] sm:$0xff] }
 0x188   : > { %958 = vst [vmem:[%s901_s14 + $0x70] sm:$0xff] %v957_v52 }
 0x189 PF: > { %s15_s21 = sadd.s32 1, %s1390_s21   ;;  %s1675_s15 = smov %s1370_s16 }
 0x18a   : > { %p12_p0 = scmp.ge.s32.totalorder %s15_s21, 6   ;;  %s1676_s16 = smov %s1475_s30 }
 0x18b   : > { %s1677_s17 = smov %s1382_s19  ;;  %s1678_s18 = smov %s1386_s20 }
 0x18c   : > { %s1679_s19 = smov %s1682_s22  ;;  %s1680_s20 = smov %s1686_s23 }
 0x18d   :  { %14 = sbr.rel (!%p12_p0) target bundleno = 4 (0x4), region = 183 }

// kernel: qrnn_forward.3
= control target key start
LH: loop header
LB: loop body
LE: loop exit
PB: predicated region body
PF: predicated region fallthrough
CT: control target
= control target key end

     0   :  { %10 = vsyncpa [#allocation9], 0  ;;  %s1737_s0 = inlined_call_operand.vmem [shape: bf16[16,16,128], index: 0, kind: input, shape index: {}]   ;;  %s1738_s1 = inlined_call_operand.vmem [shape: bf16[128,384], index: 1, kind: input, shape index: {}]   ;;  %s1739_s2 = inlined_call_operand.vmem [shape: f32[1,384], index: 2, kind: input, shape index: {}]   ;;  %s1740_s3 = inlined_call_operand.hbm [shape: f32[16,16,128], index: 3, kind: output, shape index: {0}]   ;;  %s1741_s4 = inlined_call_operand.vmem [shape: f32[1,16,128], index: 4, kind: output, shape index: {1}]  }
   0x1   :  { %12 = vsyncpa [#allocation9 + $0x1], 0  ;;  %s1440_s15 = smov 0   ;;  %s1442_s16 = smov 0  }
   0x2   :  { %s1444_s17 = smov 0   ;;  %s1446_s18 = smov 0  }
   0x3   :  { %s1448_s19 = smov 0   ;;  %s1450_s20 = smov 0  }
   0x4   :  { %s1452_s21 = smov 0   ;;  %s1454_s22 = smov 0  }
   0x5 LB: > { %s1020_s23 = sadd.s32 4294967295, %s1407_s22   ;;  %s1021_s24 = sadd.s32 4294967294, %s1407_s22   ;;  %s1407_s22 = sphi %s1454_s22, %s18_s22   ;;  %s1403_s21 = sphi %s1452_s21, %s1752_s21   ;;  %s1399_s20 = sphi %s1450_s20, %s1751_s20   ;;  %s1395_s19 = sphi %s1448_s19, %s1750_s19   ;;  %s1391_s18 = sphi %s1446_s18, %s1749_s18   ;;  %s1387_s17 = sphi %s1444_s17, %s1748_s17   ;;  %s1383_s16 = sphi %s1442_s16, %s1747_s16   ;;  %s1379_s15 = sphi %s1440_s15, %s1746_s15  }
   0x6   : > { %s27_s25 = sadd.s32 1, %s1399_s20  ;;  %s30_s26 = sadd.s32 1, %s1403_s21 }
   0x7   : > { %p28_p0 = scmp.ge.s32.totalorder %s27_s25, 2  ;;  %p46_p1 = scmp.ne.s32.totalorder %s1387_s17, %s1383_s16 }
   0x8   : > { %p47_p2 = scmp.eq.s32.totalorder %s1407_s22, 0  ;;  %p120_p5 = scmp.eq.s32.totalorder %s1020_s23, 3 }
   0x9   : > { %s1754_s25 = smov (%p28_p0, %s27_s25), 0  ;;  %s1756_s26 = smov (!%p28_p0, %s30_s26), %s1403_s21 }
   0xa   : > { %s34_s27 = ssub.s32 %s1399_s20, %s1754_s25  ;;  %p1492_p3 = por %p47_p2, %p46_p1 }
   0xb   : > { %p32_p4 = scmp.ge.s32.totalorder %s1756_s26, 2  ;;  %p125_p6 = scmp.ne.s32.totalorder %s1383_s16, %s1379_s15 }
   0xc   : > { %p126_p7 = scmp.eq.s32.totalorder %s1021_s24, 3  ;;  %p1500_p8 = por %p120_p5, %p46_p1 }
   0xd   : > { %s1758_s26 = smov (%p32_p4, %s1756_s26), 0  ;;  %s39_s7 = sadd.s32 1, %s1387_s17 }
   0xe   : > { %p1504_p9 = por %p126_p7, %p125_p6  ;;  %s35_s5 = ssub.s32 %s1403_s21, %s1758_s26 }
   0xf   : > { %s36_s6 = sor.u32 %s35_s5, %s34_s27  ;;  %p1023_p11 = scmp.ge.s32.totalorder %s1407_s22, 4 }
  0x10   : > { %p37_p10 = scmp.eq.s32.totalorder %s36_s6, 0 }
  0x11   : > { %174 = sbr.rel (%p1023_p11) target bundleno = 35 (0x23), region = 24 }
  0x12   : > { %s1512_s8 = scalar_select %p37_p10, %s1387_s17, %s39_s7  }
  0x18   : > { %177 = sbr.rel (!%p1492_p3) target bundleno = 35 (0x23), region = 28  ;;  %s179_s9 = sand.u32 (%p1492_p3), 1, %s1387_s17  }
  0x19   : > { %s1083_s10 = sshll.u32 (%p1492_p3), %s1399_s20, 4  ;;  %s1024_s11 = sshll.u32 (%p1492_p3), %s179_s9, 5 }
  0x1a   : > { %s184_s12 = sadd.s32 (%p1492_p3), %s1403_s21, %s1083_s10  ;;  %s181_s27 = scalar_lea.vmem (%p1492_p3), [#allocation7], %s1024_s11 }
  0x1b   : > { %s1027_s13 = sshll.u32 (%p1492_p3), %s184_s12, 2 }
  0x1c   : > { %s186_s24 = scalar_lea.vmem (%p1492_p3), %s1737_s0, %s1027_s13 }
  0x1d   : > { %v202_v0 = vld [vmem:[%s186_s24] sm:$0xf] (%p1492_p3)  ;;  %v204_v1 = vld [vmem:[%s186_s24 + $0x8] sm:$0xf] (%p1492_p3)  ;;  %v206_v2 = vld [vmem:[%s186_s24 + $0x10] sm:$0xf] (%p1492_p3) }
  0x1e   : > { %203 = vst [vmem:[%s181_s27] sm:$0xf] (%p1492_p3), %v202_v0  ;;  %205 = vst [vmem:[%s181_s27 + $0x4] sm:$0xf] (%p1492_p3), %v204_v1  ;;  %v208_v3 = vld [vmem:[%s186_s24 + $0x18] sm:$0xf] (%p1492_p3) }
  0x1f   : > { %207 = vst [vmem:[%s181_s27 + $0x8] sm:$0xf] %v206_v2  ;;  %v210_v4 = vld [vmem:[%s186_s24 + $0x20] sm:$0xf]  ;;  %v212_v5 = vld [vmem:[%s186_s24 + $0x28] sm:$0xf] }
  0x20   : > { %209 = vst [vmem:[%s181_s27 + $0xc] sm:$0xf] %v208_v3  ;;  %211 = vst [vmem:[%s181_s27 + $0x10] sm:$0xf] %v210_v4  ;;  %v214_v6 = vld [vmem:[%s186_s24 + $0x30] sm:$0xf] }
  0x21   : > { %213 = vst [vmem:[%s181_s27 + $0x14] sm:$0xf] %v212_v5  ;;  %v216_v7 = vld [vmem:[%s186_s24 + $0x38] sm:$0xf]  ;;  %215 = vst [vmem:[%s181_s27 + $0x18] sm:$0xf] %v214_v6 }
  0x22   : > { %217 = vst [vmem:[%s181_s27 + $0x1c] sm:$0xf] %v216_v7 }
  0x23 PF: > { %p1028_p12 = scmp.ge.s32.totalorder %s1407_s22, 1  ;;  %p255_p13 = scmp.lt.s32.totalorder %s1407_s22, 5 }
  0x25   : > { %p256_p0 = pnand %p1028_p12, %p255_p13 }
  0x26   : > { %p293_p1 = scmp.lt.s32.totalorder (!%p256_p0), %s1395_s19, 1  ;;  %v1197_v8 = vld [vmem:[%s1738_s1 + $0x4] ss:$12 sps:$4 sm:$0xff] (!%p256_p0)   ;;  %v1199_v9 = vld [vmem:[%s1738_s1] ss:$12 sps:$4 sm:$0xff] (!%p256_p0)   ;;  %v1409_v10 = vmov (!%p256_p0), 0   ;;  %v340_v37 = vlaneseq (!%p256_p0) }
  0x27   : > { %259 = sbr.rel (%p256_p0) target bundleno = 403 (0x193), region = 69  ;;  %539 = vmatprep.mubr.bf16.mxu0 (!%p256_p0), %v1409_v10  ;;  %507 = vmatprep.subr.bf16.mxu0 (!%p256_p0), %v1197_v8  ;;  %v1200_v11 = vld [vmem:[%s1738_s1 + $0x1c] ss:$12 sps:$4 sm:$0xff] (!%p256_p0)   ;;  %v1202_v12 = vld [vmem:[%s1738_s1 + $0x18] ss:$12 sps:$4 sm:$0xff] (!%p256_p0)   ;;  %s1549_s6 = sand.u32 (!%p256_p0), 1, %s1383_s16  }
  0x28   : > { %508 = vmatpush1.bf16.msra.mxu0 (!%p256_p0), %v1199_v9  ;;  %v1203_v13 = vld [vmem:[%s1738_s1 + $0x34] ss:$12 sps:$4 sm:$0xff] (!%p256_p0)   ;;  %v1205_v15 = vld [vmem:[%s1738_s1 + $0x30] ss:$12 sps:$4 sm:$0xff] (!%p256_p0)   ;;  %v1206_v16 = vld [vmem:[%s1738_s1 + $0x4c] ss:$12 sps:$4 sm:$0xff] (!%p256_p0)  }
  0x29   : > { %509 = vmatprep.subr.bf16.mxu0 (!%p256_p0), %v1200_v11  ;;  %v1209_v14 = vld [vmem:[%s1738_s1 + $0x8] ss:$12 sps:$4 sm:$0xff] (!%p256_p0)   ;;  %v1213_v17 = vld [vmem:[%s1738_s1 + $0x20] ss:$12 sps:$4 sm:$0xff] (!%p256_p0)   ;;  %s1029_s27 = sshll.u32 (!%p256_p0), %s1549_s6, 5  ;;  %v341_v38 = vshrl.u32 (!%p256_p0), %v340_v37, 7 }
  0x2a   : > { %1097 = vmatprep.subr.bf16.mxu1 (!%p256_p0), %v1209_v14  ;;  %v1217_v18 = vld [vmem:[%s1738_s1 + $0x38] ss:$12 sps:$4 sm:$0xff] (!%p256_p0)   ;;  %v1208_v19 = vld [vmem:[%s1738_s1 + $0x48] ss:$12 sps:$4 sm:$0xff] (!%p256_p0)   ;;  %v1212_v21 = vld [vmem:[%s1738_s1 + $0x60] ss:$12 sps:$4 sm:$0xff] (!%p256_p0)  }
  0x2b   : > { %1098 = vmatpush3.bf16.msra.mxu1 (!%p256_p0), %v1209_v14  ;;  %v1210_v20 = vld [vmem:[%s1738_s1 + $0x64] ss:$12 sps:$4 sm:$0xff] (!%p256_p0)   ;;  %v1214_v23 = vld [vmem:[%s1738_s1 + $0x7c] ss:$12 sps:$4 sm:$0xff] (!%p256_p0)   ;;  %s1583_s10 = scalar_lea.vmem (!%p256_p0), [#allocation7], %s1029_s27  ;;  %v346_v39 = vsub.s32 (!%p256_p0), 1, %v341_v38 }
  0x2c   : > { %510 = vmatpush1.bf16.msra.mxu0 (!%p256_p0), %v1202_v12  ;;  %1099 = vmatprep.subr.bf16.mxu1 (!%p256_p0), %v1213_v17  ;;  %v1221_v22 = vld [vmem:[%s1738_s1 + $0x50] ss:$12 sps:$4 sm:$0xff] (!%p256_p0)   ;;  %v1226_v24 = vld [vmem:[%s1583_s10] sm:$0xff] (!%p256_p0)   ;;  %v1216_v26 = vld [vmem:[%s1738_s1 + $0x78] ss:$12 sps:$4 sm:$0xff] (!%p256_p0)   ;;  %v342_v41 = vsub.s32 (!%p256_p0), 0, %v341_v38 }
  0x2d   : > { %511 = vmatprep.subr.bf16.mxu0 (!%p256_p0), %v1203_v13  ;;  %v1225_v25 = vld [vmem:[%s1738_s1 + $0x68] ss:$12 sps:$4 sm:$0xff] (!%p256_p0)   ;;  %1113 = vmatprep.mubr.bf16.mxu1 (!%p256_p0), %v1226_v24  ;;  %v1227_v28 = vld [vmem:[%s1738_s1 + $0x80] ss:$12 sps:$4 sm:$0xff] (!%p256_p0)   ;;  %v1220_v29 = vld [vmem:[%s1738_s1 + $0x90] ss:$12 sps:$4 sm:$0xff] (!%p256_p0)  }
  0x2e   : > { %s294_s9 = scalar_select %p293_p1, %s1395_s19, 1  ;;  %v1218_v27 = vld [vmem:[%s1738_s1 + $0x94] ss:$12 sps:$4 sm:$0xff]   ;;  %v1222_v30 = vld [vmem:[%s1738_s1 + $0xac] ss:$12 sps:$4 sm:$0xff]   ;;  %v350_v43 = vsub.s32 2, %v341_v38 }
  0x2f   : > { %1100 = vmatpush3.bf16.msra.mxu1 %v1213_v17  ;;  %v1228_v31 = vld [vmem:[%s1738_s1 + $0x98] ss:$12 sps:$4 sm:$0xff]   ;;  %v1224_v32 = vld [vmem:[%s1738_s1 + $0xa8] ss:$12 sps:$4 sm:$0xff]   ;;  %v1230_v33 = vld [vmem:[%s1738_s1 + $0xb0] ss:$12 sps:$4 sm:$0xff]  }
  0x30   : > { %s1031_s14 = sshll.u32 %s294_s9, 3  ;;  %512 = vmatpush1.bf16.msra.mxu0 %v1205_v15  ;;  %1101 = vmatprep.subr.bf16.mxu1 %v1217_v18  ;;  %v1229_v34 = vld [vmem:[%s1583_s10 + $0x8] sm:$0xff]   ;;  %v1231_v35 = vld [vmem:[%s1583_s10 + $0x10] sm:$0xff]   ;;  %v1232_v36 = vld [vmem:[%s1583_s10 + $0x18] sm:$0xff]   ;;  %s1745_s10 = sshll.u32 %s1549_s6, 6 }
  0x31   : > { %s1546_s5 = scalar_lea.vmem %s1741_s4, %s1031_s14  ;;  %513 = vmatprep.subr.bf16.mxu0 %v1206_v16  ;;  %v338_v40 = vld [vmem:[%s1739_s2] sm:$0x7]  ;;  %s1663_s9 = scalar_lea.vmem [#allocation8], %s1745_s10 }
  0x32   : > { %v1622_v42 = vrot.slane %v338_v40, %v346_v39  ;;  %v1624_v46 = vrot.slane %v338_v40, %v342_v41  ;;  %v1627_v50 = vrot.slane %v338_v40, %v350_v43  ;;  %p1076_p2 = scmp.ne.s32.totalorder %s1391_s18, 0 }
  0x33   : > { %1102 = vmatpush3.bf16.msra.mxu1 %v1217_v18 }
  0x34   : > { %514 = vmatpush1.bf16.msra.mxu0 %v1208_v19  ;;  %1103 = vmatprep.subr.bf16.mxu1 %v1221_v22 }
  0x35   : > { %515 = vmatprep.subr.bf16.mxu0 %v1210_v20 }
  0x37   : > { %1104 = vmatpush3.bf16.msra.mxu1 %v1221_v22 }
  0x38   : > { %516 = vmatpush1.bf16.msra.mxu0 %v1212_v21  ;;  %1105 = vmatprep.subr.bf16.mxu1 %v1225_v25 }
  0x39   : > { %517 = vmatprep.subr.bf16.mxu0 %v1214_v23 }
  0x3b   : > { %1106 = vmatpush3.bf16.msra.mxu1 %v1225_v25 }
  0x3c   : > { %518 = vmatpush1.bf16.msra.mxu0 %v1216_v26  ;;  %1107 = vmatprep.subr.bf16.mxu1 %v1227_v28 }
  0x3d   : > { %519 = vmatprep.subr.bf16.mxu0 %v1218_v27 }
  0x3f   : > { %1108 = vmatpush3.bf16.msra.mxu1 %v1227_v28 }
  0x40   : > { %520 = vmatpush1.bf16.msra.mxu0 %v1220_v29  ;;  %1109 = vmatprep.subr.bf16.mxu1 %v1228_v31 }
  0x41   : > { %521 = vmatprep.subr.bf16.mxu0 %v1222_v30 }
  0x43   : > { %1110 = vmatpush3.bf16.msra.mxu1 %v1228_v31 }
  0x44   : > { %522 = vmatpush1.bf16.msra.mxu0 %v1224_v32  ;;  %1111 = vmatprep.subr.bf16.mxu1 %v1230_v33 }
  0x47   : > { %540 = vmatmul.mubr.bf16.vlgmr.msra.gmra.mrb[0].mxu0 %v1226_v24  ;;  %1112 = vmatpush3.bf16.msra.mxu1 %v1230_v33 }
  0x48   : > { %549 = vmatprep.mubr.bf16.mxu0 %v1409_v10 }
  0x4a   : > { %1114 = vmatmul.mubr.bf16.vlgmr.msra.gmra.mrb[0].mxu1 %v1229_v34 }
  0x4b   : > { %1117 = vmatprep.mubr.bf16.mxu1 %v1231_v35 }
  0x4f   : > { %550 = vmatmul.mubr.bf16.gmra.mrb[4].mxu0 %v1229_v34 }
  0x50   : > { %559 = vmatprep.mubr.bf16.mxu0 %v1409_v10 }
  0x52   : > { %1118 = vmatmul.mubr.bf16.gmra.mrb[4].mxu1 %v1232_v36 }
  0x57   : > { %560 = vmatmul.mubr.bf16.gmra.mrb[8].mxu0 %v1231_v35 }
  0x58   : > { %569 = vmatprep.mubr.bf16.mxu0 %v1409_v10 }
  0x5f   : > { %570 = vmatmul.mubr.bf16.gmra.mrb[12].mxu0 %v1232_v36 }
 0x11a   : > { %v541_v44 = vpop.f32.mrb[0].mxu0 }
 0x11b   : > { %v543_v45 = vpop.f32.mrb[1].mxu0  ;;  %v542_v53 = vadd.f32 %v541_v44, %v1624_v46 }
 0x11c   : > { %v544_v47 = vadd.f32 %v543_v45, %v1622_v42  ;;  %v545_v48 = vpop.f32.mrb[2].mxu0 }
 0x11d   : > { %v547_v49 = vpop.f32.mrb[3].mxu0  ;;  %v1115_v55 = vpop.f32.mrb[0].mxu1  ;;  %v546_v56 = vadd.f32 %v545_v48, %v1624_v46 }
 0x11e   : > { %v1060_v51 = vmul.f32 -1.442695, %v544_v47  ;;  %v548_v52 = vadd.f32 %v547_v49, %v1622_v42  ;;  %v623_v57 = vadd.f32 %v1115_v55, %v1627_v50  ;;  %v614_v58 = vpop.f32.mrb[1].mxu1 }
 0x11f   : > { %v615_v60 = vadd.f32 %v614_v58, %v1627_v50  ;;  %v1116_v61 = vpop.f32.mrb[2].mxu1 }
 0x120   : > { %1233 = vpow2.f32 %v1060_v51  ;;  %v1061_v54 = vmul.f32 -1.442695, %v548_v52  ;;  %v1070_v0 = vmul.f32 -1.442695, %v623_v57  ;;  %v626_v1 = vadd.f32 %v1116_v61, %v1627_v50  ;;  %v617_v2 = vpop.f32.mrb[3].mxu1 }
 0x121   : > { %v618_v5 = vadd.f32 %v617_v2, %v1627_v50  ;;  %v1068_v7 = vmul.f32 -1.442695, %v615_v60 }
 0x122   : > { %1235 = vpow2.f32 %v1061_v54  ;;  %v551_v59 = vpop.f32.mrb[4].mxu0  ;;  %v1071_v10 = vmul.f32 -1.442695, %v626_v1 }
 0x123   : > { %v552_v62 = vadd.f32 %v551_v59, %v1624_v46  ;;  %v553_v63 = vpop.f32.mrb[5].mxu0  ;;  %1237 = vtanh.f32 %v542_v53  ;;  %v1069_v12 = vmul.f32 -1.442695, %v618_v5 }
 0x124   : > { %v554_v3 = vadd.f32 %v553_v63, %v1622_v42  ;;  %v555_v4 = vpop.f32.mrb[6].mxu0  ;;  %1239 = vtanh.f32 %v546_v56 }
 0x125   : > { %v557_v6 = vpop.f32.mrb[7].mxu0  ;;  %1241 = vpow2.f32 %v1070_v0  ;;  %v1119_v13 = vpop.f32.mrb[4].mxu1  ;;  %v556_v16 = vadd.f32 %v555_v4, %v1624_v46 }
 0x126   : > { %v1062_v8 = vmul.f32 -1.442695, %v554_v3  ;;  %v558_v9 = vadd.f32 %v557_v6, %v1622_v42  ;;  %1243 = vtanh.f32 %v552_v62  ;;  %v630_v14 = vpop.f32.mrb[5].mxu1  ;;  %v639_v25 = vadd.f32 %v1119_v13, %v1627_v50 }
 0x127   : > { %v1120_v18 = vpop.f32.mrb[6].mxu1  ;;  %v631_v43 = vadd.f32 %v630_v14, %v1627_v50 }
 0x128   : > { %1245 = vpow2.f32 %v1062_v8  ;;  %v1063_v11 = vmul.f32 -1.442695, %v558_v9  ;;  %v633_v21 = vpop.f32.mrb[7].mxu1  ;;  %v1074_v35 = vmul.f32 -1.442695, %v639_v25  ;;  %v642_v57 = vadd.f32 %v1120_v18, %v1627_v50 }
 0x129   : > { %1247 = vpow2.f32 %v1068_v7  ;;  %v1072_v60 = vmul.f32 -1.442695, %v631_v43  ;;  %v634_v2 = vadd.f32 %v633_v21, %v1627_v50 }
 0x12a   : > { %v1234_v15 = vpop.eup %1233  ;;  %1249 = vpow2.f32 %v1063_v11  ;;  %v561_v17 = vpop.f32.mrb[8].mxu0  ;;  %v1075_v6 = vmul.f32 -1.442695, %v642_v57  ;;  %v1410_v57 = vmov (!%p1076_p2), 0.0  }
 0x12b   : > { %v677_v19 = vadd.f32 1.0, %v1234_v15  ;;  %v563_v20 = vpop.f32.mrb[9].mxu0  ;;  %1251 = vpow2.f32 %v1071_v10  ;;  %v562_v27 = vadd.f32 %v561_v17, %v1624_v46  ;;  %v1073_v13 = vmul.f32 -1.442695, %v634_v2  ;;  %793 = vst [vmem:[#allocation6] sm:$0xff] (!%p1076_p2), %v1410_v57 }
 0x12c   : > { %v1236_v22 = vpop.eup %1235  ;;  %v564_v23 = vadd.f32 %v563_v20, %v1622_v42  ;;  %v565_v24 = vpop.f32.mrb[10].mxu0  ;;  %1253 = vpow2.f32 %v1069_v12 }
 0x12d   : > { %1255 = vrcp.f32 %v677_v19  ;;  %v678_v26 = vadd.f32 1.0, %v1236_v22  ;;  %v567_v28 = vpop.f32.mrb[11].mxu0  ;;  %v1238_v29 = vpop.eup %1237  ;;  %v566_v56 = vadd.f32 %v565_v24, %v1624_v46 }
 0x12e   : > { %1257 = vtanh.f32 %v556_v16  ;;  %v1064_v30 = vmul.f32 -1.442695, %v564_v23  ;;  %v568_v31 = vadd.f32 %v567_v28, %v1622_v42  ;;  %v1240_v32 = vpop.eup %1239 }
 0x12f   : > { %1259 = vrcp.f32 %v678_v26  ;;  %v1242_v33 = vpop.eup %1241 }
 0x130   : > { %1261 = vpow2.f32 %v1064_v30  ;;  %v1065_v34 = vmul.f32 -1.442695, %v568_v31  ;;  %v1644_v36 = vpop.eup %1243  ;;  %v727_v37 = vadd.f32 1.0, %v1242_v33 }
 0x131   : > { %1263 = vtanh.f32 %v562_v27 }
 0x132   : > { %v1246_v38 = vpop.eup %1245  ;;  %1265 = vpow2.f32 %v1065_v34  ;;  %v1646_v39 = vpop.f32.mrb[12].mxu0 }
 0x133   : > { %v1248_v40 = vpop.eup %1247  ;;  %v679_v41 = vadd.f32 1.0, %v1246_v38  ;;  %1267 = vrcp.f32 %v727_v37  ;;  %v573_v44 = vpop.f32.mrb[13].mxu0  ;;  %v572_v24 = vadd.f32 %v1646_v39, %v1624_v46 }
 0x134   : > { %v1250_v45 = vpop.eup %1249  ;;  %v725_v47 = vadd.f32 1.0, %v1248_v40  ;;  %1269 = vpow2.f32 %v1074_v35  ;;  %v574_v48 = vadd.f32 %v573_v44, %v1622_v42  ;;  %v1650_v49 = vpop.f32.mrb[14].mxu0 }
 0x135   : > { %v1252_v51 = vpop.eup %1251  ;;  %1271 = vrcp.f32 %v679_v41  ;;  %v680_v52 = vadd.f32 1.0, %v1250_v45  ;;  %v577_v53 = vpop.f32.mrb[15].mxu0  ;;  %v576_v38 = vadd.f32 %v1650_v49, %v1624_v46 }
 0x136   : > { %v1254_v54 = vpop.eup %1253  ;;  %1273 = vrcp.f32 %v725_v47  ;;  %v728_v55 = vadd.f32 1.0, %v1252_v51  ;;  %v1066_v0 = vmul.f32 -1.442695, %v574_v48  ;;  %v578_v9 = vadd.f32 %v577_v53, %v1622_v42 }
 0x137   : > { %v1256_v58 = vpop.eup %1255  ;;  %1275 = vrcp.f32 %v680_v52  ;;  %v726_v59 = vadd.f32 1.0, %v1254_v54 }
 0x138   : > { %v1258_v61 = vpop.eup %1257  ;;  %v749_v62 = vmul.f32 %v1256_v58, %v1238_v29  ;;  %v765_v63 = vsub.f32 1.0, %v1256_v58  ;;  %1277 = vrcp.f32 %v728_v55  ;;  %v1067_v16 = vmul.f32 -1.442695, %v578_v9 }
 0x139   : > { %v1260_v1 = vpop.eup %1259  ;;  %1279 = vrcp.f32 %v726_v59 }
 0x13a   : > { %v1262_v3 = vpop.eup %1261  ;;  %757 = vst [vmem:[#allocation2] sm:$0xff] %v749_v62  ;;  %773 = vst [vmem:[#allocation3] sm:$0xff] %v765_v63  ;;  %v750_v4 = vmul.f32 %v1260_v1, %v1240_v32  ;;  %v766_v5 = vsub.f32 1.0, %v1260_v1  ;;  %1281 = vtanh.f32 %v566_v56 }
 0x13b   : > { %v1264_v7 = vpop.eup %1263  ;;  %v681_v8 = vadd.f32 1.0, %v1262_v3  ;;  %1283 = vpow2.f32 %v1072_v60 }
 0x13c   : > { %v1266_v10 = vpop.eup %1265  ;;  %758 = vst [vmem:[#allocation2 + $0x8] sm:$0xff] %v750_v4  ;;  %774 = vst [vmem:[#allocation3 + $0x8] sm:$0xff] %v766_v5  ;;  %1285 = vpow2.f32 %v1066_v0 }
 0x13d   : > { %v1268_v11 = vpop.eup %1267  ;;  %1287 = vrcp.f32 %v681_v8  ;;  %v682_v12 = vadd.f32 1.0, %v1266_v10 }
 0x13e   : > { %v1270_v50 = vpop.eup %1269  ;;  %783 = vst [vmem:[#allocation4 + $0x10] sm:$0xff] %v1268_v11  ;;  %1289 = vpow2.f32 %v1075_v6 }
 0x13f   : > { %v1272_v14 = vpop.eup %1271  ;;  %1291 = vrcp.f32 %v682_v12  ;;  %v731_v15 = vadd.f32 1.0, %v1270_v50 }
 0x140   : > { %v1274_v17 = vpop.eup %1273  ;;  %v751_v18 = vmul.f32 %v1272_v14, %v1644_v36  ;;  %v767_v19 = vsub.f32 1.0, %v1272_v14 }
 0x141   : > { %v1276_v42 = vpop.eup %1275  ;;  %781 = vst [vmem:[#allocation4] sm:$0xff] %v1274_v17  ;;  %1293 = vrcp.f32 %v731_v15 }
 0x142   : > { %v1278_v20 = vpop.eup %1277  ;;  %759 = vst [vmem:[#allocation2 + $0x10] sm:$0xff] %v751_v18  ;;  %775 = vst [vmem:[#allocation3 + $0x10] sm:$0xff] %v767_v19  ;;  %v752_v21 = vmul.f32 %v1276_v42, %v1258_v61  ;;  %v768_v22 = vsub.f32 1.0, %v1276_v42  ;;  %1295 = vpow2.f32 %v1073_v13 }
 0x143   : > { %v1280_v23 = vpop.eup %1279  ;;  %784 = vst [vmem:[#allocation4 + $0x18] sm:$0xff] %v1278_v20  ;;  %1297 = vpow2.f32 %v1067_v16 }
 0x144   : > { %v1282_v25 = vpop.eup %1281  ;;  %760 = vst [vmem:[#allocation2 + $0x18] sm:$0xff] %v752_v21  ;;  %776 = vst [vmem:[#allocation3 + $0x18] sm:$0xff] %v768_v22  ;;  %1299 = vtanh.f32 %v572_v24 }
 0x145   : > { %782 = vst [vmem:[#allocation4 + $0x8] sm:$0xff] %v1280_v23  ;;  %v1284_v26 = vpop.eup %1283 }
 0x146   : > { %v1286_v27 = vpop.eup %1285  ;;  %v729_v28 = vadd.f32 1.0, %v1284_v26 }
 0x147   : > { %v1288_v29 = vpop.eup %1287  ;;  %v683_v30 = vadd.f32 1.0, %v1286_v27 }
 0x148   : > { %v1290_v31 = vpop.eup %1289  ;;  %v753_v32 = vmul.f32 %v1288_v29, %v1264_v7  ;;  %v769_v33 = vsub.f32 1.0, %v1288_v29  ;;  %1301 = vrcp.f32 %v729_v28 }
 0x149   : > { %v1292_v34 = vpop.eup %1291  ;;  %1303 = vrcp.f32 %v683_v30  ;;  %v732_v35 = vadd.f32 1.0, %v1290_v31 }
 0x14a   : > { %761 = vst [vmem:[#allocation2 + $0x20] sm:$0xff] %v753_v32  ;;  %777 = vst [vmem:[#allocation3 + $0x20] sm:$0xff] %v769_v33  ;;  %v754_v36 = vmul.f32 %v1292_v34, %v1282_v25  ;;  %v770_v37 = vsub.f32 1.0, %v1292_v34 }
 0x14b   : > { %v1294_v39 = vpop.eup %1293  ;;  %1305 = vrcp.f32 %v732_v35 }
 0x14c   : > { %v1296_v40 = vpop.eup %1295  ;;  %762 = vst [vmem:[#allocation2 + $0x28] sm:$0xff] %v754_v36  ;;  %778 = vst [vmem:[#allocation3 + $0x28] sm:$0xff] %v770_v37  ;;  %1307 = vtanh.f32 %v576_v38 }
 0x14d   : > { %787 = vst [vmem:[#allocation4 + $0x30] sm:$0xff] %v1294_v39  ;;  %v1298_v41 = vpop.eup %1297  ;;  %v730_v43 = vadd.f32 1.0, %v1296_v40 }
 0x14e   : > { %v684_v44 = vadd.f32 1.0, %v1298_v41  ;;  %v1300_v45 = vpop.eup %1299 }
 0x14f   : > { %1309 = vrcp.f32 %v730_v43 }
 0x150   : > { %1311 = vrcp.f32 %v684_v44 }
 0x152   : > { %v1302_v47 = vpop.eup %1301 }
 0x153   : > { %v1304_v48 = vpop.eup %1303  ;;  %785 = vst [vmem:[#allocation4 + $0x20] sm:$0xff] %v1302_v47 }
 0x154   : > { %v755_v51 = vmul.f32 %v1304_v48, %v1300_v45  ;;  %v771_v52 = vsub.f32 1.0, %v1304_v48 }
 0x155   : > { %v1306_v46 = vpop.eup %1305 }
 0x156   : > { %763 = vst [vmem:[#allocation2 + $0x30] sm:$0xff] %v755_v51  ;;  %779 = vst [vmem:[#allocation3 + $0x30] sm:$0xff] %v771_v52  ;;  %v1308_v49 = vpop.eup %1307 }
 0x157   : > { %788 = vst [vmem:[#allocation4 + $0x38] sm:$0xff] %v1306_v46  ;;  %792 = sbr.rel (%p1076_p2) target bundleno = 350 (0x15e), region = 77 }
 0x159   : > { %v1310_v53 = vpop.eup %1309 }
 0x15a   : > { %v1312_v54 = vpop.eup %1311  ;;  %786 = vst [vmem:[#allocation4 + $0x28] sm:$0xff] %v1310_v53 }
 0x15b   : > { %v756_v55 = vmul.f32 %v1312_v54, %v1308_v49  ;;  %v772_v56 = vsub.f32 1.0, %v1312_v54 }
 0x15d   : > { %764 = vst [vmem:[#allocation2 + $0x38] sm:$0xff] %v756_v55  ;;  %780 = vst [vmem:[#allocation3 + $0x38] sm:$0xff] %v772_v56 }
 0x15e PF: > { %v794_v58 = vld [vmem:[#allocation6] sm:$0xff]  ;;  %v803_v63 = vld [vmem:[#allocation3 + $0x8] sm:$0xff]  ;;  %v811_v5 = vld [vmem:[#allocation3 + $0x10] sm:$0xff]  ;;  %s1084_s12 = sshll.u32 %s1391_s18, 4  ;;  %s910_s13 = sshll.u32 %s1663_s9, 4  ;;  %s1676_s13 = int_to_ptr.vmem [resolvable:$true] %s910_s13 }
 0x15f   : > { %v795_v59 = vld [vmem:[#allocation2] sm:$0xff]  ;;  %v801_v1 = vld [vmem:[#allocation2 + $0x8] sm:$0xff]  ;;  %v809_v7 = vld [vmem:[#allocation2 + $0x10] sm:$0xff]  ;;  %s907_s11 = sadd.s32 %s1395_s19, %s1084_s12  ;;  %s891_s27 = scalar_lea.sflag [#allocation9], %s1549_s6 }
 0x160   : > { %v796_v60 = vld [vmem:[#allocation3] sm:$0xff]  ;;  %v858_v4 = vld [vmem:[#allocation4 + $0x8] sm:$0xff]  ;;  %v859_v10 = vld [vmem:[#allocation4 + $0x10] sm:$0xff]  ;;  %s1080_s23 = sshll.u32 %s907_s11, 7  ;;  %s1313_s24 = scalar_lea.vmem %s1676_s13, 1024 }
 0x161   : > { %v797_v61 = vmul.f32 %v796_v60, %v794_v58  ;;  %v857_v62 = vld [vmem:[#allocation4] sm:$0xff]  ;;  %v819_v11 = vld [vmem:[#allocation3 + $0x18] sm:$0xff]  ;;  %v835_v21 = vld [vmem:[#allocation3 + $0x28] sm:$0xff]  ;;  %s1681_s19 = scalar_lea.hbm %s1740_s3, %s1080_s23  ;;  %p1314_p3 = scmp.ne.s32.totalorder %s1676_s13, %s1313_s24 }
 0x162   : > { %v817_v50 = vld [vmem:[#allocation2 + $0x18] sm:$0xff]  ;;  %v827_v16 = vld [vmem:[#allocation3 + $0x20] sm:$0xff]  ;;  %v833_v23 = vld [vmem:[#allocation2 + $0x28] sm:$0xff]  ;;  %s1411_s28 = smov [#allocation8]  }
 0x163   : > { %v798_v0 = vadd.f32 %v797_v61, %v795_v59  ;;  %v860_v15 = vld [vmem:[#allocation4 + $0x18] sm:$0xff]  ;;  %v825_v18 = vld [vmem:[#allocation2 + $0x20] sm:$0xff]  ;;  %v862_v26 = vld [vmem:[#allocation4 + $0x28] sm:$0xff]  ;;  %p1315_p4 = pnand %p1314_p3, %p1500_p8  ;;  %s1317_s7 = sshll.u32 %s1411_s28, 4  ;;  %s1318_s7 = int_to_ptr.vmem [resolvable:$false] %s1317_s7 }
 0x164   : > { %v861_v20 = vld [vmem:[#allocation4 + $0x20] sm:$0xff]  ;;  %v843_v27 = vld [vmem:[#allocation3 + $0x30] sm:$0xff]  ;;  %v851_v32 = vld [vmem:[#allocation3 + $0x38] sm:$0xff]  ;;  %s1319_s10 = scalar_lea.vmem %s1318_s7, 2048  ;;  %p1320_p6 = scmp.lt.s32.totalorder %s1676_s13, %s1318_s7 }
 0x165   : > { %v873_v2 = vmul.f32 %v857_v62, %v798_v0  ;;  %v804_v3 = vmul.f32 %v803_v63, %v798_v0  ;;  %v841_v29 = vld [vmem:[#allocation2 + $0x30] sm:$0xff]  ;;  %v849_v35 = vld [vmem:[#allocation2 + $0x38] sm:$0xff]  ;;  %p1316_p5 = pneg %p1315_p4  ;;  %p1321_p7 = scmp.lt.s32.totalorder %s1319_s10, %s1313_s24 }
 0x166   : > { %v863_v33 = vld [vmem:[#allocation4 + $0x30] sm:$0xff]  ;;  %v864_v38 = vld [vmem:[#allocation4 + $0x38] sm:$0xff] }
 0x167   : > { %881 = vst [vmem:[%s1663_s9] sm:$0xff] %v873_v2  ;;  %v805_v6 = vadd.f32 %v804_v3, %v801_v1  ;;  %p1322_p10 = por %p1321_p7, %p1320_p6 }
 0x169   : > { %v874_v8 = vmul.f32 %v858_v4, %v805_v6  ;;  %v812_v9 = vmul.f32 %v811_v5, %v805_v6  ;;  %p1323_p11 = pnand %p1322_p10, %p1316_p5 }
 0x16b   : > { %882 = vst [vmem:[%s1663_s9 + $0x8] sm:$0xff] %v874_v8  ;;  %v813_v12 = vadd.f32 %v812_v9, %v809_v7 }
 0x16d   : > { %v875_v13 = vmul.f32 %v859_v10, %v813_v12  ;;  %v820_v14 = vmul.f32 %v819_v11, %v813_v12 }
 0x16f   : > { %883 = vst [vmem:[%s1663_s9 + $0x10] sm:$0xff] %v875_v13  ;;  %v821_v17 = vadd.f32 %v820_v14, %v817_v50 }
 0x171   : > { %v876_v19 = vmul.f32 %v860_v15, %v821_v17  ;;  %v828_v42 = vmul.f32 %v827_v16, %v821_v17 }
 0x173   : > { %884 = vst [vmem:[%s1663_s9 + $0x18] sm:$0xff] %v876_v19  ;;  %v829_v22 = vadd.f32 %v828_v42, %v825_v18 }
 0x175   : > { %v877_v24 = vmul.f32 %v861_v20, %v829_v22  ;;  %v836_v25 = vmul.f32 %v835_v21, %v829_v22 }
 0x177   : > { %885 = vst [vmem:[%s1663_s9 + $0x20] sm:$0xff] %v877_v24  ;;  %v837_v28 = vadd.f32 %v836_v25, %v833_v23 }
 0x179   : > { %v878_v30 = vmul.f32 %v862_v26, %v837_v28  ;;  %v844_v31 = vmul.f32 %v843_v27, %v837_v28 }
 0x17b   : > { %886 = vst [vmem:[%s1663_s9 + $0x28] sm:$0xff] %v878_v30  ;;  %v845_v34 = vadd.f32 %v844_v31, %v841_v29 }
 0x17d   : > { %v852_v36 = vmul.f32 %v851_v32, %v845_v34  ;;  %v879_v37 = vmul.f32 %v863_v33, %v845_v34 }
 0x17f   : > { %887 = vst [vmem:[%s1663_s9 + $0x30] sm:$0xff] %v879_v37  ;;  %v853_v39 = vadd.f32 %v852_v36, %v849_v35 }
 0x181   : > { %v880_v40 = vmul.f32 %v864_v38, %v853_v39  ;;  %856 = vst [vmem:[#allocation6] sm:$0xff] %v853_v39  ;;  %889 = vst [vmem:[%s1546_s5] sm:$0xff] %v853_v39 }
 0x183   : > { %888 = vst [vmem:[%s1663_s9 + $0x38] sm:$0xff] %v880_v40 }
 0x184   : > { %1326 = shalt.err (!%p1323_p11)
}
 0x185   : > { %s1327_s5 = scalar_lea.hbm %s1681_s19, 1024  ;;  %s1331_s11 = scalar_lea.hbm %s1740_s3, 4096 }
 0x186   : > { %p1328_p12 = scmp.ne.s32.totalorder %s1681_s19, %s1327_s5  ;;  %p1332_p1 = scmp.lt.u32.totalorder %s1681_s19, %s1740_s3 }
 0x187   : > { %p1333_p2 = scmp.lt.u32.totalorder %s1331_s11, %s1327_s5  ;;  %p1335_p4 = scmp.lt.u32.totalorder %s1327_s5, %s1681_s19 }
 0x188   : > { %p1329_p13 = pnand %p1328_p12, %p1500_p8 }
 0x189   : > { %p1334_p3 = por %p1333_p2, %p1332_p1 }
 0x18a   : > { %p1330_p0 = pneg %p1329_p13 }
 0x18b   : > { %p1336_p5 = por %p1335_p4, %p1334_p3 }
 0x18d   : > { %p1337_p6 = pnand %p1336_p5, %p1330_p0 }
 0x18f   : > { %1340 = shalt.err (!%p1337_p6)
}
 0x190   : > { %s1412_s14 = smov 128   ;;  %s1413_s24 = smov 256  }
 0x191   : > { %s1414_s28 = smov 8  }
 0x192   : > { %1121 = dma.vmem_to_hbm [thread:$0]  (%p1500_p8), %s1676_s13, 1024, %s1681_s19, %s891_s27, %s1412_s14, %s1413_s24, %s1414_s28  }
 0x193 PF: > { %p1127_p7 = scmp.ge.s32.totalorder %s1407_s22, 2  ;;  %s928_s7 = sand.u32 1, %s1379_s15  }
 0x194   : > { %s929_s10 = scalar_lea.sflag [#allocation9], %s928_s7 }
 0x195   : > { %p1124_p10 = pnand %p1127_p7, %p1504_p9 }
 0x197   : > { %1374 = dma.done.wait (!%p1124_p10), %s929_s10, 1024  }
 0x198   : > { %1376 = vsyncadd (!%p1124_p10), %s929_s10, 4294966272  ;;  %s18_s22 = sadd.s32 1, %s1407_s22   ;;  %s1746_s15 = smov %s1383_s16 }
 0x199   : > { %p15_p11 = scmp.ge.s32.totalorder %s18_s22, 6   ;;  %s1747_s16 = smov %s1387_s17 }
 0x19a   : > { %s1748_s17 = smov %s1512_s8  ;;  %s1749_s18 = smov %s1399_s20 }
 0x19b   : > { %s1750_s19 = smov %s1403_s21  ;;  %s1751_s20 = smov %s1754_s25 }
 0x19c   : > { %s1752_s21 = smov %s1758_s26  ;;  %17 = sbr.rel (!%p15_p11) target bundleno = 5 (0x5), region = 150 }
 0x1a3   :  { %941 = vsyncpa [#allocation9], 1 }
 0x1a4   :  { %943 = vsyncpa [#allocation9 + $0x1], 1 }

</bundles_post_ra>
